<compile_context>
chip_gen: v6e
topology: v6e:2x2x1
jax: 0.10.0
libtpu: 0.0.40
codegen_flags: <defaults>
</compile_context>

<pallas_src>
import functools
import numpy as np
import jax
import jax.numpy as jnp
from jax.experimental import pallas as pl
from jax.experimental.pallas import tpu as pltpu


# ----------------------------- tiling helpers ---------------------------------

def _rup(x, m):
    return (x + m - 1) // m * m


def _tile_m(m):
    """(padded M, tile M): tile divides padded M, multiple of 8, <= 512."""
    mp = _rup(m, 8)
    if mp <= 512:
        return mp, mp
    best_tm, best_pad = None, None
    for tm in range(512, 127, -8):
        pad = _rup(mp, tm) - mp
        if best_pad is None or pad < best_pad:
            best_tm, best_pad = tm, pad
            if pad == 0:
                break
    return mp + best_pad, best_tm


def _tile_k(k):
    kp = _rup(k, 128)
    if kp <= 512:
        return kp, kp
    best_tk, best_pad = None, None
    for tk in range(512, 127, -128):
        pad = _rup(kp, tk) - kp
        if best_pad is None or pad < best_pad:
            best_tk, best_pad = tk, pad
            if pad == 0:
                break
    return kp + best_pad, best_tk


def _tile_n(n):
    np_ = _rup(n, 128)
    if np_ <= 256:
        return np_, np_
    return (np_, 256) if np_ % 256 == 0 else (np_, 128)


def _pad2(x, mp, np_):
    m, n = x.shape
    if (m, n) == (mp, np_):
        return x
    return jnp.pad(x, ((0, mp - m), (0, np_ - n)))


# ----------------------------- Pallas kernels ---------------------------------

def _mm_bn_kernel(a_ref, w_ref, y_ref, s_ref, q_ref, acc_ref):
    """Tiled matmul; epilogue also emits per-tile column sum / sum-of-squares for BN."""
    k = pl.program_id(2)

    @pl.when(k == 0)
    def _():
        acc_ref[...] = jnp.zeros_like(acc_ref)

    acc_ref[...] += jnp.dot(a_ref[...].astype(jnp.bfloat16), w_ref[...],
                            preferred_element_type=jnp.float32)

    @pl.when(k == pl.num_programs(2) - 1)
    def _():
        acc = acc_ref[...]
        y_ref[...] = acc
        s_ref[...] = jnp.sum(acc, axis=0, keepdims=True)[None]
        q_ref[...] = jnp.sum(acc * acc, axis=0, keepdims=True)[None]


def _mm_bias_kernel(a_ref, w_ref, b_ref, o_ref, acc_ref):
    k = pl.program_id(2)

    @pl.when(k == 0)
    def _():
        acc_ref[...] = jnp.zeros_like(acc_ref)

    acc_ref[...] += jnp.dot(a_ref[...].astype(jnp.bfloat16), w_ref[...],
                            preferred_element_type=jnp.float32)

    @pl.when(k == pl.num_programs(2) - 1)
    def _():
        o_ref[...] = acc_ref[...] + b_ref[...]


def _bn_relu_kernel(y_ref, sc_ref, sh_ref, o_ref):
    o_ref[...] = jnp.maximum(y_ref[...] * sc_ref[...] + sh_ref[...], 0.0)


def _bn_relu_add_kernel(y_ref, sc_ref, sh_ref, r_ref, o_ref):
    o_ref[...] = jnp.maximum(y_ref[...] * sc_ref[...] + sh_ref[...], 0.0) + r_ref[...]


def _max9_kernel(*refs):
    o_ref = refs[-1]
    r = refs[0][...]
    for v_ref in refs[1:-1]:
        r = jnp.maximum(r, v_ref[...])
    o_ref[...] = r


def _avgpool_kernel(x_ref, o_ref):
    o_ref[...] = jnp.sum(x_ref[...], axis=0, keepdims=True) * (1.0 / 49.0)


# ----------------------------- matmul / BN wrappers ----------------------------

def _matmul_bn(a, w):
    """a:(M,K) f32 @ w:(K,N) bf16 -> (y_pad:(Mp,Np) f32, col_sum:(Np,), col_sq:(Np,))."""
    M, K = a.shape
    N = w.shape[1]
    Mp, tm = _tile_m(M)
    Kp, tk = _tile_k(K)
    Np, tn = _tile_n(N)
    a_p = _pad2(a, Mp, Kp)
    w_p = _pad2(w, Kp, Np)
    gm, gn, gk = Mp // tm, Np // tn, Kp // tk
    y, s, q = pl.pallas_call(
        _mm_bn_kernel,
        out_shape=(jax.ShapeDtypeStruct((Mp, Np), jnp.float32),
                   jax.ShapeDtypeStruct((gm, 1, Np), jnp.float32),
                   jax.ShapeDtypeStruct((gm, 1, Np), jnp.float32)),
        grid_spec=pltpu.PrefetchScalarGridSpec(
            num_scalar_prefetch=0,
            grid=(gm, gn, gk),
            in_specs=[pl.BlockSpec((tm, tk), lambda i, j, k: (i, k)),
                      pl.BlockSpec((tk, tn), lambda i, j, k: (k, j))],
            out_specs=(pl.BlockSpec((tm, tn), lambda i, j, k: (i, j)),
                       pl.BlockSpec((1, 1, tn), lambda i, j, k: (i, 0, j)),
                       pl.BlockSpec((1, 1, tn), lambda i, j, k: (i, 0, j))),
            scratch_shapes=[pltpu.VMEM((tm, tn), jnp.float32)],
        ),
        compiler_params=pltpu.CompilerParams(
            dimension_semantics=("parallel", "parallel", "arbitrary")),
    )(a_p, w_p)
    return y, jnp.sum(s, axis=(0, 1)), jnp.sum(q, axis=(0, 1))


def _bn_relu_apply(y_p, col_sum, col_sq, gamma, beta, m_true, res_p=None):
    """Training-mode BN (biased variance over rows) + ReLU (+ residual add), tiled over rows."""
    Mp, Np = y_p.shape
    n = gamma.shape[0]
    g = jnp.pad(gamma, (0, Np - n)) if Np != n else gamma
    b = jnp.pad(beta, (0, Np - n)) if Np != n else beta
    mean = (col_sum / m_true).reshape(1, Np)
    var = jnp.maximum(col_sq.reshape(1, Np) / m_true - mean * mean, 0.0)
    scale = g.reshape(1, Np) * jax.lax.rsqrt(var + 1e-5)
    shift = b.reshape(1, Np) - mean * scale

    _, tm = _tile_m(Mp)
    row_spec = pl.BlockSpec((tm, Np), lambda i: (i, 0))
    vec_spec = pl.BlockSpec((1, Np), lambda i: (0, 0))
    if res_p is None:
        kernel = _bn_relu_kernel
        in_specs = [row_spec, vec_spec, vec_spec]
        args = (y_p, scale, shift)
    else:
        kernel = _bn_relu_add_kernel
        in_specs = [row_spec, vec_spec, vec_spec, row_spec]
        args = (y_p, scale, shift, res_p)
    return pl.pallas_call(
        kernel,
        out_shape=jax.ShapeDtypeStruct((Mp, Np), jnp.float32),
        grid_spec=pltpu.PrefetchScalarGridSpec(
            num_scalar_prefetch=0, grid=(Mp // tm,),
            in_specs=in_specs, out_specs=row_spec),
        compiler_params=pltpu.CompilerParams(dimension_semantics=("parallel",)),
    )(*args)


# ----------------------------- conv / pool / linear ----------------------------

def _im2col(x, k, stride, pad):
    B, H, W, C = x.shape
    Ho = (H + 2 * pad - k) // stride + 1
    Wo = (W + 2 * pad - k) // stride + 1
    xp = jnp.pad(x, ((0, 0), (pad, pad), (pad, pad), (0, 0)))
    cols = []
    for i in range(k):
        for j in range(k):
            v = jax.lax.slice(xp, (0, i, j, 0),
                              (B, i + (Ho - 1) * stride + 1, j + (Wo - 1) * stride + 1, C),
                              (1, stride, stride, 1))
            cols.append(v)
    a = jnp.concatenate(cols, axis=-1).reshape(B * Ho * Wo, k * k * C)
    return a, (B, Ho, Wo)


def _conv_to_matrix(x, ksize, stride, pad):
    if ksize == 1:  # 1x1 conv: no im2col, just (strided) reshape
        if stride > 1:
            x = x[:, ::stride, ::stride, :]
        B, Ho, Wo, C = x.shape
        return x.reshape(B * Ho * Wo, C), (B, Ho, Wo)
    return _im2col(x, ksize, stride, pad)


@functools.partial(jax.jit, static_argnames=("ksize", "stride", "pad"))
def conv_bn_relu(x, w, gamma, beta, *, ksize, stride, pad):
    """CnnBlock: Conv2d(no bias) -> BatchNorm2d(train mode) -> ReLU.  x NHWC f32, w (k*k*Cin,Cout) bf16."""
    a, (B, Ho, Wo) = _conv_to_matrix(x, ksize, stride, pad)
    M = a.shape[0]
    N = w.shape[1]
    y_p, s, q = _matmul_bn(a, w)
    out_p = _bn_relu_apply(y_p, s, q, gamma, beta, M)
    out = out_p[:M, :N] if out_p.shape != (M, N) else out_p
    return out.reshape(B, Ho, Wo, N)


@functools.partial(jax.jit, static_argnames=("ksize", "stride", "pad"))
def conv_bn_relu_add(x, w, gamma, beta, res, *, ksize, stride, pad):
    """Final CnnBlock of a bottleneck fused with the residual: relu(bn(conv(x))) + res."""
    a, (B, Ho, Wo) = _conv_to_matrix(x, ksize, stride, pad)
    M = a.shape[0]
    N = w.shape[1]
    y_p, s, q = _matmul_bn(a, w)
    Mp, Np = y_p.shape
    res_p = _pad2(res.reshape(M, N), Mp, Np)
    out_p = _bn_relu_apply(y_p, s, q, gamma, beta, M, res_p)
    out = out_p[:M, :N] if out_p.shape != (M, N) else out_p
    return out.reshape(B, Ho, Wo, N)


@jax.jit
def maxpool_3x3_s2_p1(x):  # NHWC
    B, H, W, C = x.shape
    Ho = (H + 2 - 3) // 2 + 1
    Wo = (W + 2 - 3) // 2 + 1
    xp = jnp.pad(x, ((0, 0), (1, 1), (1, 1), (0, 0)), constant_values=-jnp.inf)
    M = B * Ho * Wo
    Mp, tm = _tile_m(M)
    views = []
    for i in range(3):
        for j in range(3):
            v = jax.lax.slice(xp, (0, i, j, 0),
                              (B, i + (Ho - 1) * 2 + 1, j + (Wo - 1) * 2 + 1, C),
                              (1, 2, 2, 1)).reshape(M, C)
            if Mp != M:
                v = jnp.pad(v, ((0, Mp - M), (0, 0)))
            views.append(v)
    spec = pl.BlockSpec((tm, C), lambda i: (i, 0))
    out = pl.pallas_call(
        _max9_kernel,
        out_shape=jax.ShapeDtypeStruct((Mp, C), x.dtype),
        grid_spec=pltpu.PrefetchScalarGridSpec(
            num_scalar_prefetch=0, grid=(Mp // tm,),
            in_specs=[spec] * 9, out_specs=spec),
        compiler_params=pltpu.CompilerParams(dimension_semantics=("parallel",)),
    )(*views)
    return out[:M].reshape(B, Ho, Wo, C)


@jax.jit
def avgpool7(x):  # NHWC with H = W = 7  (AvgPool2d(kernel_size=7))
    B, H, W, C = x.shape
    xr = x.reshape(B, H * W, C)
    xr = jnp.pad(xr, ((0, 0), (0, 56 - H * W), (0, 0)))   # 49 -> 56 rows (zero padded)
    xr = xr.reshape(B * 56, C)
    return pl.pallas_call(
        _avgpool_kernel,
        out_shape=jax.ShapeDtypeStruct((B, C), x.dtype),
        grid=(B,),
        in_specs=[pl.BlockSpec((56, C), lambda b: (b, 0))],
        out_specs=pl.BlockSpec((1, C), lambda b: (b, 0)),
    )(xr)


@jax.jit
def linear(x, w, b):
    """x:(M,K) f32 @ w:(K,N) bf16 + b:(N,) f32 -> (M,N) f32."""
    M, K = x.shape
    N = w.shape[1]
    Mp, tm = _tile_m(M)
    Kp, tk = _tile_k(K)
    Np, tn = _tile_n(N)
    a_p = _pad2(x, Mp, Kp)
    w_p = _pad2(w, Kp, Np)
    b_p = (jnp.pad(b, (0, Np - N)) if Np != N else b).reshape(1, Np)
    out = pl.pallas_call(
        _mm_bias_kernel,
        out_shape=jax.ShapeDtypeStruct((Mp, Np), jnp.float32),
        grid_spec=pltpu.PrefetchScalarGridSpec(
            num_scalar_prefetch=0,
            grid=(Mp // tm, Np // tn, Kp // tk),
            in_specs=[pl.BlockSpec((tm, tk), lambda i, j, k: (i, k)),
                      pl.BlockSpec((tk, tn), lambda i, j, k: (k, j)),
                      pl.BlockSpec((1, tn), lambda i, j, k: (0, j))],
            out_specs=pl.BlockSpec((tm, tn), lambda i, j, k: (i, j)),
            scratch_shapes=[pltpu.VMEM((tm, tn), jnp.float32)],
        ),
        compiler_params=pltpu.CompilerParams(
            dimension_semantics=("parallel", "parallel", "arbitrary")),
    )(a_p, w_p, b_p)
    return out[:M, :N]


# ----------------------------- parameters --------------------------------------

def _conv_params(rng, cin, cout, k):
    w = rng.standard_normal((k * k * cin, cout), dtype=np.float32) * np.float32(
        np.sqrt(2.0 / (k * k * cin)))
    gamma = (1.0 + 0.1 * rng.standard_normal(cout)).astype(np.float32)
    beta = (0.1 * rng.standard_normal(cout)).astype(np.float32)
    return dict(w=jnp.asarray(w).astype(jnp.bfloat16),   # MXU operands in bf16
                gamma=jnp.asarray(gamma), beta=jnp.asarray(beta))


def build_params(num_class, seed=0):
    rng = np.random.default_rng(seed)
    params = {"layer1": _conv_params(rng, 3, 64, 7)}

    def bottleneck(cin, cout, inter, stride):
        return dict(
            conv1=_conv_params(rng, cin, inter, 1),
            conv2=_conv_params(rng, inter, inter, 3),
            conv3=_conv_params(rng, inter, cout, 1),
            ident=_conv_params(rng, cin, cout, 1),
            stride=stride,
        )

    def make_layer(num_blocks, cin, cout, stride):
        if stride == 1:
            red, exp = 1, 2
        else:
            red, exp = 2, 1
        blocks = [bottleneck(cin, cout, int(cin * exp / red), stride)]
        for _ in range(1, num_blocks):
            blocks.append(bottleneck(cout, cout, int(cout * 1 / (2 * stride)), 1))
        return blocks

    params["layer2"] = make_layer(3, 64, 256, 1)
    params["layer3"] = make_layer(8, 256, 512, 2)
    params["layer4"] = make_layer(36, 512, 1024, 2)
    params["layer5"] = make_layer(3, 1024, 2048, 2)
    params["fc1_w"] = jnp.asarray(
        rng.standard_normal((2048, 1000), dtype=np.float32)
        / np.float32(np.sqrt(2048))).astype(jnp.bfloat16)
    params["fc1_b"] = jnp.asarray((0.01 * rng.standard_normal(1000)).astype(np.float32))
    params["fc2_w"] = jnp.asarray(
        rng.standard_normal((1000, num_class), dtype=np.float32)
        / np.float32(np.sqrt(1000))).astype(jnp.bfloat16)
    params["fc2_b"] = jnp.asarray((0.01 * rng.standard_normal(num_class)).astype(np.float32))
    return params


# ----------------------------- forward ------------------------------------------

def bottleneck_forward(x, p):
    s = p["stride"]
    idn = conv_bn_relu(x, p["ident"]["w"], p["ident"]["gamma"], p["ident"]["beta"],
                       ksize=1, stride=s, pad=0)
    y = conv_bn_relu(x, p["conv1"]["w"], p["conv1"]["gamma"], p["conv1"]["beta"],
                     ksize=1, stride=1, pad=0)
    y = conv_bn_relu(y, p["conv2"]["w"], p["conv2"]["gamma"], p["conv2"]["beta"],
                     ksize=3, stride=s, pad=1)
    # residual add fused into the last CnnBlock's BN/ReLU pass
    return conv_bn_relu_add(y, p["conv3"]["w"], p["conv3"]["gamma"], p["conv3"]["beta"], idn,
                            ksize=1, stride=1, pad=0)


def resnet152_forward(x_nchw, params):
    x = jnp.transpose(x_nchw, (0, 2, 3, 1))  # NCHW -> NHWC
    p1 = params["layer1"]
    x = conv_bn_relu(x, p1["w"], p1["gamma"], p1["beta"], ksize=7, stride=2, pad=3)
    x = maxpool_3x3_s2_p1(x)
    for layer in ("layer2", "layer3", "layer4", "layer5"):
        for blk in params[layer]:
            x = bottleneck_forward(x, blk)
    x = avgpool7(x)                                  # (B, 2048) == Flatten of (B,2048,1,1)
    x = linear(x, params["fc1_w"], params["fc1_b"])  # (B, 1000)
    x = linear(x, params["fc2_w"], params["fc2_b"])  # (B, num_class)
    return x


if __name__ == "__main__":
    num_class = 10
    # AvgPool2d(7) + Linear(2048) pin the spatial size to 224x224; keep batch=1 to stay small.
    key = jax.random.PRNGKey(0)
    x = jax.random.normal(key, (1, 3, 224, 224), dtype=jnp.float32)
    params = build_params(num_class, seed=0)
    out = resnet152_forward(x, params)
    out = jax.block_until_ready(out)
    assert out.shape == (1, num_class), out.shape
    assert bool(jnp.all(jnp.isfinite(out)))
    print("KERNEL_OK")
</pallas_src>

<mosaic_0001>
module attributes {stable_mosaic.version = 11 : i64} {
  func.func @_mm_bn_kernel(%arg0: i32, %arg1: i32, %arg2: i32, %arg3: memref<448x256xf32, #tpu.memory_space<vmem>>, %arg4: memref<256x128xbf16, #tpu.memory_space<vmem>>, %arg5: memref<448x128xf32, #tpu.memory_space<vmem>>, %arg6: memref<1x1x128xf32, #tpu.memory_space<vmem>>, %arg7: memref<1x1x128xf32, #tpu.memory_space<vmem>>, %arg8: memref<448x128xf32, #tpu.memory_space<vmem>>) attributes {dimension_semantics = [#tpu.dimension_semantics<parallel>, #tpu.dimension_semantics<parallel>, #tpu.dimension_semantics<arbitrary>], iteration_bounds = array<i64: 28, 1, 1>, scalar_prefetch = 0 : i64, scratch_operands = 1 : i64, tpu.core_type = #tpu.core_type<tc>, window_params = [{transform_indices = @transform_0, window_bounds = array<i64: 448, 256>}, {transform_indices = @transform_1, window_bounds = array<i64: 256, 128>}, {transform_indices = @transform_2, window_bounds = array<i64: 448, 128>}, {transform_indices = @transform_3, window_bounds = array<i64: 1, 1, 128>}, {transform_indices = @transform_4, window_bounds = array<i64: 1, 1, 128>}]} {
    %c0_i32 = arith.constant 0 : i32
    %0 = arith.cmpi eq, %arg2, %c0_i32 : i32
    %1 = arith.extui %0 : i1 to i32
    %c0_i32_0 = arith.constant 0 : i32
    %2 = arith.cmpi ne, %1, %c0_i32_0 : i32
    scf.if %2 {
      %cst_10 = arith.constant 0.000000e+00 : f32
      %13 = vector.broadcast %cst_10 : f32 to vector<448x128xf32>
      %c0_11 = arith.constant 0 : index
      %c0_12 = arith.constant 0 : index
      %14 = vector.load %arg8[%c0_11, %c0_12] : memref<448x128xf32, #tpu.memory_space<vmem>>, vector<448x128xf32>
      tpu.vector_store %arg8[%c0_11, %c0_12], %13 {strides = array<i32>} : memref<448x128xf32, #tpu.memory_space<vmem>>, vector<448x128xf32>,
    } else {
    }
    %c0 = arith.constant 0 : index
    %c0_1 = arith.constant 0 : index
    %3 = vector.load %arg8[%c0, %c0_1] : memref<448x128xf32, #tpu.memory_space<vmem>>, vector<448x128xf32>
    %c0_2 = arith.constant 0 : index
    %c0_3 = arith.constant 0 : index
    %4 = vector.load %arg3[%c0_2, %c0_3] : memref<448x256xf32, #tpu.memory_space<vmem>>, vector<448x256xf32>
    %5 = arith.truncf %4 : vector<448x256xf32> to vector<448x256xbf16>
    %c0_4 = arith.constant 0 : index
    %c0_5 = arith.constant 0 : index
    %6 = vector.load %arg4[%c0_4, %c0_5] : memref<256x128xbf16, #tpu.memory_space<vmem>>, vector<256x128xbf16>
    %cst = arith.constant dense<0.000000e+00> : vector<448x128xf32>
    %7 = tpu.matmul %5, %6, %cst {dimension_numbers = #tpu.dot_dimension_numbers<[1], [0], [0], [1], [0, 0, 1, 1], [], []>} : vector<448x256xbf16>, vector<256x128xbf16>, vector<448x128xf32> -> vector<448x128xf32>
    %8 = arith.addf %3, %7 : vector<448x128xf32>
    %c0_6 = arith.constant 0 : index
    %c0_7 = arith.constant 0 : index
    %9 = vector.load %arg8[%c0_6, %c0_7] : memref<448x128xf32, #tpu.memory_space<vmem>>, vector<448x128xf32>
    tpu.vector_store %arg8[%c0_6, %c0_7], %8 {strides = array<i32>} : memref<448x128xf32, #tpu.memory_space<vmem>>, vector<448x128xf32>,
    %c0_i32_8 = arith.constant 0 : i32
    %10 = arith.cmpi eq, %arg2, %c0_i32_8 : i32
    %11 = arith.extui %10 : i1 to i32
    %c0_i32_9 = arith.constant 0 : i32
    %12 = arith.cmpi ne, %11, %c0_i32_9 : i32
    scf.if %12 {
      %c0_10 = arith.constant 0 : index
      %c0_11 = arith.constant 0 : index
      %13 = vector.load %arg8[%c0_10, %c0_11] : memref<448x128xf32, #tpu.memory_space<vmem>>, vector<448x128xf32>
      %c0_12 = arith.constant 0 : index
      %c0_13 = arith.constant 0 : index
      %14 = vector.load %arg5[%c0_12, %c0_13] : memref<448x128xf32, #tpu.memory_space<vmem>>, vector<448x128xf32>
      tpu.vector_store %arg5[%c0_12, %c0_13], %13 {strides = array<i32>} : memref<448x128xf32, #tpu.memory_space<vmem>>, vector<448x128xf32>,
      %cst_14 = arith.constant dense<0.000000e+00> : vector<128xf32>
      %15 = vector.multi_reduction <add>, %13, %cst_14 [0] : vector<448x128xf32> to vector<128xf32>
      %16 = vector.shape_cast %15 : vector<128xf32> to vector<1x128xf32>
      %17 = vector.shape_cast %16 : vector<1x128xf32> to vector<1x1x128xf32>
      %c0_15 = arith.constant 0 : index
      %c0_16 = arith.constant 0 : index
      %c0_17 = arith.constant 0 : index
      %18 = vector.load %arg6[%c0_15, %c0_16, %c0_17] : memref<1x1x128xf32, #tpu.memory_space<vmem>>, vector<1x1x128xf32>
      tpu.vector_store %arg6[%c0_15, %c0_16, %c0_17], %17 {strides = array<i32>} : memref<1x1x128xf32, #tpu.memory_space<vmem>>, vector<1x1x128xf32>,
      %19 = arith.mulf %13, %13 : vector<448x128xf32>
      %cst_18 = arith.constant dense<0.000000e+00> : vector<128xf32>
      %20 = vector.multi_reduction <add>, %19, %cst_18 [0] : vector<448x128xf32> to vector<128xf32>
      %21 = vector.shape_cast %20 : vector<128xf32> to vector<1x128xf32>
      %22 = vector.shape_cast %21 : vector<1x128xf32> to vector<1x1x128xf32>
      %c0_19 = arith.constant 0 : index
      %c0_20 = arith.constant 0 : index
      %c0_21 = arith.constant 0 : index
      %23 = vector.load %arg7[%c0_19, %c0_20, %c0_21] : memref<1x1x128xf32, #tpu.memory_space<vmem>>, vector<1x1x128xf32>
      tpu.vector_store %arg7[%c0_19, %c0_20, %c0_21], %22 {strides = array<i32>} : memref<1x1x128xf32, #tpu.memory_space<vmem>>, vector<1x1x128xf32>,
    } else {
    }
    return
  }
  func.func @transform_0(%arg0: i32, %arg1: i32, %arg2: i32) -> (i32, i32) {
    %c0_i32 = arith.constant 0 : i32
    return %arg0, %arg2 : i32, i32
  }
  func.func @transform_1(%arg0: i32, %arg1: i32, %arg2: i32) -> (i32, i32) {
    %c0_i32 = arith.constant 0 : i32
    return %arg2, %arg1 : i32, i32
  }
  func.func @transform_2(%arg0: i32, %arg1: i32, %arg2: i32) -> (i32, i32) {
    %c0_i32 = arith.constant 0 : i32
    return %arg0, %arg1 : i32, i32
  }
  func.func @transform_3(%arg0: i32, %arg1: i32, %arg2: i32) -> (i32, i32, i32) {
    %c0_i32 = arith.constant 0 : i32
    %c0_i32_0 = arith.constant 0 : i32
    return %arg0, %c0_i32, %arg1 : i32, i32, i32
  }
  func.func @transform_4(%arg0: i32, %arg1: i32, %arg2: i32) -> (i32, i32, i32) {
    %c0_i32 = arith.constant 0 : i32
    %c0_i32_0 = arith.constant 0 : i32
    return %arg0, %c0_i32, %arg1 : i32, i32, i32
  }
}

module attributes {stable_mosaic.version = 11 : i64} {
  func.func @_bn_relu_kernel(%arg0: i32, %arg1: memref<448x128xf32, #tpu.memory_space<vmem>>, %arg2: memref<1x128xf32, #tpu.memory_space<vmem>>, %arg3: memref<1x128xf32, #tpu.memory_space<vmem>>, %arg4: memref<448x128xf32, #tpu.memory_space<vmem>>) attributes {dimension_semantics = [#tpu.dimension_semantics<parallel>], iteration_bounds = array<i64: 28>, scalar_prefetch = 0 : i64, scratch_operands = 0 : i64, tpu.core_type = #tpu.core_type<tc>, window_params = [{transform_indices = @transform_0, window_bounds = array<i64: 448, 128>}, {pipeline_mode = #tpu.pipeline_mode<synchronous>, transform_indices = @transform_1, window_bounds = array<i64: 1, 128>}, {pipeline_mode = #tpu.pipeline_mode<synchronous>, transform_indices = @transform_2, window_bounds = array<i64: 1, 128>}, {transform_indices = @transform_3, window_bounds = array<i64: 448, 128>}]} {
    %c0 = arith.constant 0 : index
    %c0_0 = arith.constant 0 : index
    %0 = vector.load %arg1[%c0, %c0_0] : memref<448x128xf32, #tpu.memory_space<vmem>>, vector<448x128xf32>
    %c0_1 = arith.constant 0 : index
    %c0_2 = arith.constant 0 : index
    %1 = vector.load %arg2[%c0_1, %c0_2] : memref<1x128xf32, #tpu.memory_space<vmem>>, vector<1x128xf32>
    %2 = vector.broadcast %1 : vector<1x128xf32> to vector<448x128xf32>
    %3 = arith.mulf %0, %2 : vector<448x128xf32>
    %c0_3 = arith.constant 0 : index
    %c0_4 = arith.constant 0 : index
    %4 = vector.load %arg3[%c0_3, %c0_4] : memref<1x128xf32, #tpu.memory_space<vmem>>, vector<1x128xf32>
    %5 = vector.broadcast %4 : vector<1x128xf32> to vector<448x128xf32>
    %6 = arith.addf %3, %5 : vector<448x128xf32>
    %cst = arith.constant 0.000000e+00 : f32
    %7 = vector.broadcast %cst : f32 to vector<448x128xf32>
    %8 = arith.maximumf %6, %7 : vector<448x128xf32>
    %c0_5 = arith.constant 0 : index
    %c0_6 = arith.constant 0 : index
    %9 = vector.load %arg4[%c0_5, %c0_6] : memref<448x128xf32, #tpu.memory_space<vmem>>, vector<448x128xf32>
    tpu.vector_store %arg4[%c0_5, %c0_6], %8 {strides = array<i32>} : memref<448x128xf32, #tpu.memory_space<vmem>>, vector<448x128xf32>,
    return
  }
  func.func @transform_0(%arg0: i32) -> (i32, i32) {
    %c0_i32 = arith.constant 0 : i32
    %c0_i32_0 = arith.constant 0 : i32
    return %arg0, %c0_i32 : i32, i32
  }
  func.func @transform_1(%arg0: i32) -> (i32, i32) {
    %c0_i32 = arith.constant 0 : i32
    %c0_i32_0 = arith.constant 0 : i32
    %c0_i32_1 = arith.constant 0 : i32
    return %c0_i32, %c0_i32_0 : i32, i32
  }
  func.func @transform_2(%arg0: i32) -> (i32, i32) {
    %c0_i32 = arith.constant 0 : i32
    %c0_i32_0 = arith.constant 0 : i32
    %c0_i32_1 = arith.constant 0 : i32
    return %c0_i32, %c0_i32_0 : i32, i32
  }
  func.func @transform_3(%arg0: i32) -> (i32, i32) {
    %c0_i32 = arith.constant 0 : i32
    %c0_i32_0 = arith.constant 0 : i32
    return %arg0, %c0_i32 : i32, i32
  }
}

</mosaic_0001>

<bundles_post_ra>
// kernel: conv_bn_relu.2
= control target key start
LH: loop header
LB: loop body
LE: loop exit
PB: predicated region body
PF: predicated region fallthrough
CT: control target
= control target key end

     0   :  { %s1713_s15 = smov 0   ;;  %s1715_s16 = smov 0   ;;  %s2289_s0 = inlined_call_operand.vmem [shape: f32[12544,256], index: 0, kind: input, shape index: {}]   ;;  %s2290_s1 = inlined_call_operand.vmem [shape: bf16[256,128], index: 1, kind: input, shape index: {}]   ;;  %s2291_s2 = inlined_call_operand.vmem [shape: f32[12544,128], index: 2, kind: output, shape index: {0}]   ;;  %s2292_s3 = inlined_call_operand.vmem [shape: f32[28,1,128], index: 3, kind: output, shape index: {1}]   ;;  %s2293_s4 = inlined_call_operand.vmem [shape: f32[28,1,128], index: 4, kind: output, shape index: {2}]  }
   0x1   :  { %s1717_s17 = smov 0  }
   0x2 LB: > { %s34_s18 = sadd.s32 1, %s1681_s16  ;;  %p1567_p0 = scmp.ge.s32.totalorder %s1685_s17, 1  ;;  %s1685_s17 = sphi %s1717_s17, %s15_s17   ;;  %s1681_s16 = sphi %s1715_s16, %s2295_s16   ;;  %s1677_s15 = sphi %s1713_s15, %s2294_s15  }
   0x3   : > { %p36_p1 = scmp.ge.s32.totalorder %s34_s18, 28  ;;  %p217_p2 = scmp.lt.s32.totalorder %s1685_s17, 29 }
   0x5   : > { %s2297_s18 = smov (%p36_p1, %s34_s18), 0  ;;  %p218_p3 = pnand %p1567_p0, %p217_p2 }
   0x6   : > { %s271_s21 = smul.u32 (!%p218_p3), 56, %s1677_s15  ;;  %p301_p5 = scmp.lt.s32.totalorder (!%p218_p3), %s1677_s15, 27 }
   0x7   : > { %221 = sbr.rel (%p218_p3) target bundleno = 451 (0x1c3), region = 28 }
   0x8   : > { %p273_p4 = scmp.lt.s32.totalorder (!%p218_p3), %s271_s21, 1567 }
   0xc   : > { %v1647_v0 = vld [vmem:[%s2290_s1 + $0x38] sm:$0xff]   ;;  %v1687_v1 = vmov 0   ;;  %v1648_v2 = vld [vmem:[%s2290_s1 + $0x30] sm:$0xff]   ;;  %v1649_v3 = vld [vmem:[%s2290_s1 + $0x28] sm:$0xff]   ;;  %s2299_s21 = smov (!%p273_p4, %s271_s21), 1567  ;;  %s2301_s15 = smov (!%p301_p5, %s1677_s15), 27 }
   0xd   : > { %726 = vmatprep.subr.bf16.mxu0 %v1687_v1  ;;  %1590 = vmatprep.subr.bf16.mxu1 %v1687_v1  ;;  %v1650_v4 = vld [vmem:[%s2290_s1 + $0x20] sm:$0xff]   ;;  %s1589_s28 = sshll.u32 %s2299_s21, 4  ;;  %v1651_v5 = vld [vmem:[%s2290_s1 + $0x18] sm:$0xff]   ;;  %v1652_v9 = vld [vmem:[%s2290_s1 + $0x10] sm:$0xff]   ;;  %s1570_s10 = sshll.u32 %s2299_s21, 3 }
   0xe   : > { %727 = vmatpush1.bf16.msra.mxu0 %v1647_v0  ;;  %1606 = vmatpush1.bf16.msra.mxu1 %v1647_v0  ;;  %s1760_s5 = scalar_lea.vmem %s2289_s0, %s1589_s28  ;;  %v1653_v10 = vld [vmem:[%s2290_s1 + $0x8] sm:$0xff]   ;;  %v1654_v13 = vld [vmem:[%s2290_s1] sm:$0xff]   ;;  %v1655_v15 = vld [vmem:[%s2290_s1 + $0x78] sm:$0xff]   ;;  %s1938_s13 = scalar_lea.vmem %s2291_s2, %s1570_s10 }
   0xf   : > { %728 = vmatprep.subr.bf16.mxu0 %v1687_v1  ;;  %1591 = vmatprep.subr.bf16.mxu1 %v1687_v1  ;;  %v431_v6 = vld [vmem:[%s1760_s5 + $0x8] sm:$0xff]  ;;  %v433_v7 = vld [vmem:[%s1760_s5 + $0x18] sm:$0xff]  ;;  %v1656_v16 = vld [vmem:[%s2290_s1 + $0x70] sm:$0xff]   ;;  %s306_s14 = scalar_lea.vmem %s2292_s3, %s2301_s15  ;;  %s312_s22 = scalar_lea.vmem %s2293_s4, %s2301_s15 }
  0x10   : > { %v543_v8 = vpack.c.bf16 %v433_v7, %v431_v6  ;;  %v487_v11 = vld [vmem:[%s1760_s5 + $0x1c8] sm:$0xff]  ;;  %v489_v12 = vld [vmem:[%s1760_s5 + $0x1d8] sm:$0xff]  ;;  %v1658_v18 = vld [vmem:[%s2290_s1 + $0x60] sm:$0xff]  }
  0x11   : > { %v571_v14 = vpack.c.bf16 %v489_v12, %v487_v11  ;;  %v1657_v17 = vld [vmem:[%s2290_s1 + $0x68] sm:$0xff]   ;;  %v1659_v19 = vld [vmem:[%s2290_s1 + $0x58] sm:$0xff]   ;;  %v1660_v20 = vld [vmem:[%s2290_s1 + $0x50] sm:$0xff]  }
  0x12   : > { %729 = vmatpush1.bf16.msra.mxu0 %v1648_v2  ;;  %1607 = vmatpush1.bf16.msra.mxu1 %v1648_v2  ;;  %v1661_v21 = vld [vmem:[%s2290_s1 + $0x48] sm:$0xff]   ;;  %v1662_v22 = vld [vmem:[%s2290_s1 + $0x40] sm:$0xff]   ;;  %v432_v24 = vld [vmem:[%s1760_s5 + $0x10] sm:$0xff] }
  0x13   : > { %730 = vmatprep.subr.bf16.mxu0 %v1687_v1  ;;  %1592 = vmatprep.subr.bf16.mxu1 %v1687_v1  ;;  %v430_v23 = vld [vmem:[%s1760_s5] sm:$0xff]  ;;  %v435_v25 = vld [vmem:[%s1760_s5 + $0x28] sm:$0xff]  ;;  %v488_v27 = vld [vmem:[%s1760_s5 + $0x1d0] sm:$0xff] }
  0x14   : > { %758 = vmatprep.mubr.bf16.mxu0 %v543_v8  ;;  %870 = vmatprep.mubr.bf16.mxu1 %v571_v14  ;;  %v486_v26 = vld [vmem:[%s1760_s5 + $0x1c0] sm:$0xff]  ;;  %v437_v28 = vld [vmem:[%s1760_s5 + $0x38] sm:$0xff]  ;;  %v491_v29 = vld [vmem:[%s1760_s5 + $0x1e8] sm:$0xff]  ;;  %v542_v31 = vpack.c.bf16 %v432_v24, %v430_v23 }
  0x15   : > { %v493_v30 = vld [vmem:[%s1760_s5 + $0x1f8] sm:$0xff]  ;;  %v570_v32 = vpack.c.bf16 %v488_v27, %v486_v26  ;;  %v545_v33 = vpack.c.bf16 %v437_v28, %v435_v25  ;;  %v434_v35 = vld [vmem:[%s1760_s5 + $0x20] sm:$0xff]  ;;  %v436_v36 = vld [vmem:[%s1760_s5 + $0x30] sm:$0xff] }
  0x16   : > { %731 = vmatpush1.bf16.msra.mxu0 %v1649_v3  ;;  %1608 = vmatpush1.bf16.msra.mxu1 %v1649_v3  ;;  %v573_v34 = vpack.c.bf16 %v493_v30, %v491_v29  ;;  %v439_v37 = vld [vmem:[%s1760_s5 + $0x48] sm:$0xff]  ;;  %v490_v38 = vld [vmem:[%s1760_s5 + $0x1e0] sm:$0xff]  ;;  %v492_v39 = vld [vmem:[%s1760_s5 + $0x1f0] sm:$0xff]  ;;  %v544_v43 = vpack.c.bf16 %v436_v36, %v434_v35 }
  0x17   : > { %732 = vmatprep.subr.bf16.mxu0 %v1687_v1  ;;  %1593 = vmatprep.subr.bf16.mxu1 %v1687_v1  ;;  %v441_v40 = vld [vmem:[%s1760_s5 + $0x58] sm:$0xff]  ;;  %v495_v41 = vld [vmem:[%s1760_s5 + $0x208] sm:$0xff]  ;;  %v572_v44 = vpack.c.bf16 %v492_v39, %v490_v38  ;;  %v438_v47 = vld [vmem:[%s1760_s5 + $0x40] sm:$0xff] }
  0x18   : > { %v497_v42 = vld [vmem:[%s1760_s5 + $0x218] sm:$0xff]  ;;  %v547_v45 = vpack.c.bf16 %v441_v40, %v439_v37  ;;  %v440_v48 = vld [vmem:[%s1760_s5 + $0x50] sm:$0xff]  ;;  %v443_v49 = vld [vmem:[%s1760_s5 + $0x68] sm:$0xff] }
  0x19   : > { %v575_v46 = vpack.c.bf16 %v497_v42, %v495_v41  ;;  %v494_v50 = vld [vmem:[%s1760_s5 + $0x200] sm:$0xff]  ;;  %v496_v51 = vld [vmem:[%s1760_s5 + $0x210] sm:$0xff]  ;;  %v445_v52 = vld [vmem:[%s1760_s5 + $0x78] sm:$0xff]  ;;  %v546_v55 = vpack.c.bf16 %v440_v48, %v438_v47 }
  0x1a   : > { %733 = vmatpush1.bf16.msra.mxu0 %v1650_v4  ;;  %1609 = vmatpush1.bf16.msra.mxu1 %v1650_v4  ;;  %v499_v53 = vld [vmem:[%s1760_s5 + $0x228] sm:$0xff]  ;;  %v501_v54 = vld [vmem:[%s1760_s5 + $0x238] sm:$0xff]  ;;  %v574_v56 = vpack.c.bf16 %v496_v51, %v494_v50  ;;  %v549_v57 = vpack.c.bf16 %v445_v52, %v443_v49  ;;  %v442_v59 = vld [vmem:[%s1760_s5 + $0x60] sm:$0xff] }
  0x1b   : > { %734 = vmatprep.subr.bf16.mxu0 %v1687_v1  ;;  %1594 = vmatprep.subr.bf16.mxu1 %v1687_v1  ;;  %v577_v58 = vpack.c.bf16 %v501_v54, %v499_v53  ;;  %v444_v60 = vld [vmem:[%s1760_s5 + $0x70] sm:$0xff]  ;;  %v447_v61 = vld [vmem:[%s1760_s5 + $0x88] sm:$0xff]  ;;  %v498_v62 = vld [vmem:[%s1760_s5 + $0x220] sm:$0xff] }
  0x1c   : > { %v500_v63 = vld [vmem:[%s1760_s5 + $0x230] sm:$0xff]  ;;  %v449_v0 = vld [vmem:[%s1760_s5 + $0x98] sm:$0xff]  ;;  %v548_v3 = vpack.c.bf16 %v444_v60, %v442_v59  ;;  %v446_v7 = vld [vmem:[%s1760_s5 + $0x80] sm:$0xff] }
  0x1d   : > { %v505_v2 = vld [vmem:[%s1760_s5 + $0x258] sm:$0xff]  ;;  %v576_v4 = vpack.c.bf16 %v500_v63, %v498_v62  ;;  %v448_v8 = vld [vmem:[%s1760_s5 + $0x90] sm:$0xff]  ;;  %v511_v25 = vld [vmem:[%s1760_s5 + $0x288] sm:$0xff] }
  0x1e   : > { %735 = vmatpush1.bf16.msra.mxu0 %v1651_v5  ;;  %1610 = vmatpush1.bf16.msra.mxu1 %v1651_v5  ;;  %v551_v5 = vpack.c.bf16 %v449_v0, %v447_v61  ;;  %v504_v11 = vld [vmem:[%s1760_s5 + $0x250] sm:$0xff]  ;;  %v453_v12 = vld [vmem:[%s1760_s5 + $0xb8] sm:$0xff]  ;;  %v515_v37 = vld [vmem:[%s1760_s5 + $0x2a8] sm:$0xff] }
  0x1f   : > { %736 = vmatprep.subr.bf16.mxu0 %v1687_v1  ;;  %1595 = vmatprep.subr.bf16.mxu1 %v1687_v1  ;;  %v509_v14 = vld [vmem:[%s1760_s5 + $0x278] sm:$0xff]  ;;  %v508_v23 = vld [vmem:[%s1760_s5 + $0x270] sm:$0xff]  ;;  %v519_v49 = vld [vmem:[%s1760_s5 + $0x2c8] sm:$0xff] }
  0x20   : > { %v457_v24 = vld [vmem:[%s1760_s5 + $0xd8] sm:$0xff]  ;;  %v512_v35 = vld [vmem:[%s1760_s5 + $0x290] sm:$0xff]  ;;  %v523_v61 = vld [vmem:[%s1760_s5 + $0x2e8] sm:$0xff] }
  0x21   : > { %v513_v26 = vld [vmem:[%s1760_s5 + $0x298] sm:$0xff]  ;;  %v516_v47 = vld [vmem:[%s1760_s5 + $0x2b0] sm:$0xff] }
  0x22   : > { %737 = vmatpush1.bf16.msra.mxu0 %v1652_v9  ;;  %1611 = vmatpush1.bf16.msra.mxu1 %v1652_v9  ;;  %v451_v9 = vld [vmem:[%s1760_s5 + $0xa8] sm:$0xff]  ;;  %v583_v30 = vpack.c.bf16 %v513_v26, %v511_v25  ;;  %v461_v36 = vld [vmem:[%s1760_s5 + $0xf8] sm:$0xff]  ;;  %v520_v59 = vld [vmem:[%s1760_s5 + $0x2d0] sm:$0xff] }
  0x23   : > { %738 = vmatprep.subr.bf16.mxu0 %v1687_v1  ;;  %1596 = vmatprep.subr.bf16.mxu1 %v1687_v1  ;;  %v517_v38 = vld [vmem:[%s1760_s5 + $0x2b8] sm:$0xff] }
  0x24   : > { %v585_v42 = vpack.c.bf16 %v517_v38, %v515_v37  ;;  %v465_v48 = vld [vmem:[%s1760_s5 + $0x118] sm:$0xff] }
  0x25   : > { %v521_v50 = vld [vmem:[%s1760_s5 + $0x2d8] sm:$0xff] }
  0x26   : > { %739 = vmatpush1.bf16.msra.mxu0 %v1653_v10  ;;  %1612 = vmatpush1.bf16.msra.mxu1 %v1653_v10  ;;  %v502_v10 = vld [vmem:[%s1760_s5 + $0x240] sm:$0xff]  ;;  %v587_v54 = vpack.c.bf16 %v521_v50, %v519_v49  ;;  %v469_v60 = vld [vmem:[%s1760_s5 + $0x138] sm:$0xff] }
  0x27   : > { %740 = vmatprep.subr.bf16.mxu0 %v1687_v1  ;;  %1597 = vmatprep.subr.bf16.mxu1 %v1687_v1  ;;  %v525_v62 = vld [vmem:[%s1760_s5 + $0x2f8] sm:$0xff] }
  0x2a   : > { %741 = vmatpush1.bf16.msra.mxu0 %v1654_v13  ;;  %1613 = vmatpush1.bf16.msra.mxu1 %v1654_v13  ;;  %v507_v13 = vld [vmem:[%s1760_s5 + $0x268] sm:$0xff] }
  0x2b   : > { %742 = vmatprep.subr.bf16.mxu0 %v1687_v1  ;;  %1598 = vmatprep.subr.bf16.mxu1 %v1687_v1 }
  0x2e   : > { %743 = vmatpush2.bf16.msra.mxu0 %v1655_v15  ;;  %1614 = vmatpush2.bf16.msra.mxu1 %v1655_v15  ;;  %v550_v15 = vpack.c.bf16 %v448_v8, %v446_v7  ;;  %v524_v7 = vld [vmem:[%s1760_s5 + $0x2f0] sm:$0xff]  ;;  %v473_v8 = vld [vmem:[%s1760_s5 + $0x158] sm:$0xff] }
  0x2f   : > { %744 = vmatprep.subr.bf16.mxu0 %v1687_v1  ;;  %1599 = vmatprep.subr.bf16.mxu1 %v1687_v1 }
  0x32   : > { %745 = vmatpush2.bf16.msra.mxu0 %v1656_v16  ;;  %1615 = vmatpush2.bf16.msra.mxu1 %v1656_v16  ;;  %v578_v16 = vpack.c.bf16 %v504_v11, %v502_v10  ;;  %v529_v10 = vld [vmem:[%s1760_s5 + $0x318] sm:$0xff] }
  0x33   : > { %746 = vmatprep.subr.bf16.mxu0 %v1687_v1  ;;  %1600 = vmatprep.subr.bf16.mxu1 %v1687_v1 }
  0x36   : > { %747 = vmatpush2.bf16.msra.mxu0 %v1657_v17  ;;  %1616 = vmatpush2.bf16.msra.mxu1 %v1657_v17  ;;  %v553_v17 = vpack.c.bf16 %v453_v12, %v451_v9  ;;  %v527_v9 = vld [vmem:[%s1760_s5 + $0x308] sm:$0xff] }
  0x37   : > { %748 = vmatprep.subr.bf16.mxu0 %v1687_v1  ;;  %1601 = vmatprep.subr.bf16.mxu1 %v1687_v1 }
  0x3a   : > { %749 = vmatpush2.bf16.msra.mxu0 %v1658_v18  ;;  %1617 = vmatpush2.bf16.msra.mxu1 %v1658_v18  ;;  %v581_v18 = vpack.c.bf16 %v509_v14, %v507_v13  ;;  %v591_v14 = vpack.c.bf16 %v529_v10, %v527_v9 }
  0x3b   : > { %750 = vmatprep.subr.bf16.mxu0 %v1687_v1  ;;  %1602 = vmatprep.subr.bf16.mxu1 %v1687_v1 }
  0x3e   : > { %751 = vmatpush2.bf16.msra.mxu0 %v1659_v19  ;;  %1618 = vmatpush2.bf16.msra.mxu1 %v1659_v19  ;;  %v450_v19 = vld [vmem:[%s1760_s5 + $0xa0] sm:$0xff] }
  0x3f   : > { %752 = vmatprep.subr.bf16.mxu0 %v1687_v1  ;;  %1603 = vmatprep.subr.bf16.mxu1 %v1687_v1 }
  0x42   : > { %753 = vmatpush2.bf16.msra.mxu0 %v1660_v20  ;;  %1619 = vmatpush2.bf16.msra.mxu1 %v1660_v20  ;;  %v452_v20 = vld [vmem:[%s1760_s5 + $0xb0] sm:$0xff] }
  0x43   : > { %754 = vmatprep.subr.bf16.mxu0 %v1687_v1  ;;  %1604 = vmatprep.subr.bf16.mxu1 %v1687_v1  ;;  %v552_v27 = vpack.c.bf16 %v452_v20, %v450_v19  ;;  %v528_v19 = vld [vmem:[%s1760_s5 + $0x310] sm:$0xff]  ;;  %v477_v20 = vld [vmem:[%s1760_s5 + $0x178] sm:$0xff] }
  0x46   : > { %755 = vmatpush2.bf16.msra.mxu0 %v1661_v21  ;;  %1620 = vmatpush2.bf16.msra.mxu1 %v1661_v21  ;;  %v455_v21 = vld [vmem:[%s1760_s5 + $0xc8] sm:$0xff] }
  0x47   : > { %756 = vmatprep.subr.bf16.mxu0 %v1687_v1  ;;  %1605 = vmatprep.subr.bf16.mxu1 %v1687_v1  ;;  %v503_v1 = vld [vmem:[%s1760_s5 + $0x248] sm:$0xff]  ;;  %v555_v29 = vpack.c.bf16 %v457_v24, %v455_v21 }
  0x48   : > { %v579_v6 = vpack.c.bf16 %v505_v2, %v503_v1  ;;  %v589_v2 = vpack.c.bf16 %v525_v62, %v523_v61  ;;  %v531_v21 = vld [vmem:[%s1760_s5 + $0x328] sm:$0xff] }
  0x4a   : > { %757 = vmatpush2.bf16.msra.mxu0 %v1662_v22  ;;  %1621 = vmatpush2.bf16.msra.mxu1 %v1662_v22  ;;  %v506_v22 = vld [vmem:[%s1760_s5 + $0x260] sm:$0xff] }
  0x4b   : > { %v580_v28 = vpack.c.bf16 %v508_v23, %v506_v22  ;;  %v533_v22 = vld [vmem:[%s1760_s5 + $0x338] sm:$0xff] }
  0x4c   : > { %v593_v26 = vpack.c.bf16 %v533_v22, %v531_v21 }
  0x4d   : > { %759 = vmatmul.mubr.bf16.vlgmr.msra.gmra.mxu0 %v542_v31  ;;  %871 = vmatmul.mubr.bf16.vlgmr.msra.gmra.mxu1 %v570_v32  ;;  %v454_v31 = vld [vmem:[%s1760_s5 + $0xc0] sm:$0xff]  ;;  %v456_v32 = vld [vmem:[%s1760_s5 + $0xd0] sm:$0xff] }
  0x4e   : > { %766 = vmatprep.mubr.bf16.mxu0 %v545_v33  ;;  %878 = vmatprep.mubr.bf16.mxu1 %v573_v34  ;;  %v459_v33 = vld [vmem:[%s1760_s5 + $0xe8] sm:$0xff]  ;;  %v510_v34 = vld [vmem:[%s1760_s5 + $0x280] sm:$0xff]  ;;  %v554_v39 = vpack.c.bf16 %v456_v32, %v454_v31  ;;  %v532_v31 = vld [vmem:[%s1760_s5 + $0x330] sm:$0xff] }
  0x4f   : > { %v582_v40 = vpack.c.bf16 %v512_v35, %v510_v34  ;;  %v557_v41 = vpack.c.bf16 %v461_v36, %v459_v33  ;;  %v481_v32 = vld [vmem:[%s1760_s5 + $0x198] sm:$0xff]  ;;  %v535_v33 = vld [vmem:[%s1760_s5 + $0x348] sm:$0xff] }
  0x50   : > { %v537_v34 = vld [vmem:[%s1760_s5 + $0x358] sm:$0xff] }
  0x51   : > { %v595_v38 = vpack.c.bf16 %v537_v34, %v535_v33 }
  0x55   : > { %767 = vmatmul.mubr.bf16.gmra.mxu0 %v544_v43  ;;  %879 = vmatmul.mubr.bf16.gmra.mxu1 %v572_v44  ;;  %v458_v43 = vld [vmem:[%s1760_s5 + $0xe0] sm:$0xff]  ;;  %v460_v44 = vld [vmem:[%s1760_s5 + $0xf0] sm:$0xff] }
  0x56   : > { %774 = vmatprep.mubr.bf16.mxu0 %v547_v45  ;;  %886 = vmatprep.mubr.bf16.mxu1 %v575_v46  ;;  %v463_v45 = vld [vmem:[%s1760_s5 + $0x108] sm:$0xff]  ;;  %v514_v46 = vld [vmem:[%s1760_s5 + $0x2a0] sm:$0xff]  ;;  %v556_v51 = vpack.c.bf16 %v460_v44, %v458_v43  ;;  %v536_v43 = vld [vmem:[%s1760_s5 + $0x350] sm:$0xff] }
  0x57   : > { %v584_v52 = vpack.c.bf16 %v516_v47, %v514_v46  ;;  %v559_v53 = vpack.c.bf16 %v465_v48, %v463_v45  ;;  %v485_v44 = vld [vmem:[%s1760_s5 + $0x1b8] sm:$0xff]  ;;  %v539_v45 = vld [vmem:[%s1760_s5 + $0x368] sm:$0xff] }
  0x58   : > { %v541_v46 = vld [vmem:[%s1760_s5 + $0x378] sm:$0xff] }
  0x59   : > { %v597_v50 = vpack.c.bf16 %v541_v46, %v539_v45 }
  0x5d   : > { %775 = vmatmul.mubr.bf16.gmra.mxu0 %v546_v55  ;;  %887 = vmatmul.mubr.bf16.gmra.mxu1 %v574_v56  ;;  %v462_v55 = vld [vmem:[%s1760_s5 + $0x100] sm:$0xff]  ;;  %v464_v56 = vld [vmem:[%s1760_s5 + $0x110] sm:$0xff] }
  0x5e   : > { %782 = vmatprep.mubr.bf16.mxu0 %v549_v57  ;;  %894 = vmatprep.mubr.bf16.mxu1 %v577_v58  ;;  %v467_v57 = vld [vmem:[%s1760_s5 + $0x128] sm:$0xff]  ;;  %v518_v58 = vld [vmem:[%s1760_s5 + $0x2c0] sm:$0xff]  ;;  %v558_v63 = vpack.c.bf16 %v464_v56, %v462_v55 }
  0x5f   : > { %v586_v0 = vpack.c.bf16 %v520_v59, %v518_v58  ;;  %v561_v1 = vpack.c.bf16 %v469_v60, %v467_v57 }
  0x65   : > { %783 = vmatmul.mubr.bf16.gmra.mxu0 %v548_v3  ;;  %895 = vmatmul.mubr.bf16.gmra.mxu1 %v576_v4  ;;  %v466_v3 = vld [vmem:[%s1760_s5 + $0x120] sm:$0xff]  ;;  %v468_v4 = vld [vmem:[%s1760_s5 + $0x130] sm:$0xff] }
  0x66   : > { %790 = vmatprep.mubr.bf16.mxu0 %v551_v5  ;;  %902 = vmatprep.mubr.bf16.mxu1 %v579_v6  ;;  %v471_v5 = vld [vmem:[%s1760_s5 + $0x148] sm:$0xff]  ;;  %v522_v6 = vld [vmem:[%s1760_s5 + $0x2e0] sm:$0xff]  ;;  %v560_v11 = vpack.c.bf16 %v468_v4, %v466_v3 }
  0x67   : > { %v588_v12 = vpack.c.bf16 %v524_v7, %v522_v6  ;;  %v563_v13 = vpack.c.bf16 %v473_v8, %v471_v5 }
  0x6d   : > { %791 = vmatmul.mubr.bf16.gmra.mxu0 %v550_v15  ;;  %903 = vmatmul.mubr.bf16.gmra.mxu1 %v578_v16  ;;  %v470_v15 = vld [vmem:[%s1760_s5 + $0x140] sm:$0xff]  ;;  %v472_v16 = vld [vmem:[%s1760_s5 + $0x150] sm:$0xff] }
  0x6e   : > { %798 = vmatprep.mubr.bf16.mxu0 %v553_v17  ;;  %910 = vmatprep.mubr.bf16.mxu1 %v581_v18  ;;  %v475_v17 = vld [vmem:[%s1760_s5 + $0x168] sm:$0xff]  ;;  %v526_v18 = vld [vmem:[%s1760_s5 + $0x300] sm:$0xff]  ;;  %v562_v23 = vpack.c.bf16 %v472_v16, %v470_v15 }
  0x6f   : > { %v590_v24 = vpack.c.bf16 %v528_v19, %v526_v18  ;;  %v565_v25 = vpack.c.bf16 %v477_v20, %v475_v17 }
  0x75   : > { %799 = vmatmul.mubr.bf16.gmra.mxu0 %v552_v27  ;;  %911 = vmatmul.mubr.bf16.gmra.mxu1 %v580_v28  ;;  %v474_v27 = vld [vmem:[%s1760_s5 + $0x160] sm:$0xff]  ;;  %v476_v28 = vld [vmem:[%s1760_s5 + $0x170] sm:$0xff] }
  0x76   : > { %806 = vmatprep.mubr.bf16.mxu0 %v555_v29  ;;  %918 = vmatprep.mubr.bf16.mxu1 %v583_v30  ;;  %v479_v29 = vld [vmem:[%s1760_s5 + $0x188] sm:$0xff]  ;;  %v530_v30 = vld [vmem:[%s1760_s5 + $0x320] sm:$0xff]  ;;  %v564_v35 = vpack.c.bf16 %v476_v28, %v474_v27 }
  0x77   : > { %v592_v36 = vpack.c.bf16 %v532_v31, %v530_v30  ;;  %v567_v37 = vpack.c.bf16 %v481_v32, %v479_v29 }
  0x7d   : > { %807 = vmatmul.mubr.bf16.gmra.mxu0 %v554_v39  ;;  %919 = vmatmul.mubr.bf16.gmra.mxu1 %v582_v40  ;;  %v478_v39 = vld [vmem:[%s1760_s5 + $0x180] sm:$0xff]  ;;  %v480_v40 = vld [vmem:[%s1760_s5 + $0x190] sm:$0xff] }
  0x7e   : > { %814 = vmatprep.mubr.bf16.mxu0 %v557_v41  ;;  %926 = vmatprep.mubr.bf16.mxu1 %v585_v42  ;;  %v483_v41 = vld [vmem:[%s1760_s5 + $0x1a8] sm:$0xff]  ;;  %v534_v42 = vld [vmem:[%s1760_s5 + $0x340] sm:$0xff]  ;;  %v566_v47 = vpack.c.bf16 %v480_v40, %v478_v39 }
  0x7f   : > { %v594_v48 = vpack.c.bf16 %v536_v43, %v534_v42  ;;  %v569_v49 = vpack.c.bf16 %v485_v44, %v483_v41 }
  0x85   : > { %815 = vmatmul.mubr.bf16.gmra.mxu0 %v556_v51  ;;  %927 = vmatmul.mubr.bf16.gmra.mxu1 %v584_v52  ;;  %v482_v51 = vld [vmem:[%s1760_s5 + $0x1a0] sm:$0xff]  ;;  %v484_v52 = vld [vmem:[%s1760_s5 + $0x1b0] sm:$0xff] }
  0x86   : > { %822 = vmatprep.mubr.bf16.mxu0 %v559_v53  ;;  %934 = vmatprep.mubr.bf16.mxu1 %v587_v54  ;;  %v538_v53 = vld [vmem:[%s1760_s5 + $0x360] sm:$0xff]  ;;  %v540_v54 = vld [vmem:[%s1760_s5 + $0x370] sm:$0xff]  ;;  %v568_v55 = vpack.c.bf16 %v484_v52, %v482_v51 }
  0x87   : > { %v596_v56 = vpack.c.bf16 %v540_v54, %v538_v53 }
  0x8d   : > { %823 = vmatmul.mubr.bf16.gmra.mxu0 %v558_v63  ;;  %935 = vmatmul.mubr.bf16.gmra.mxu1 %v586_v0 }
  0x8e   : > { %830 = vmatprep.mubr.bf16.mxu0 %v561_v1  ;;  %942 = vmatprep.mubr.bf16.mxu1 %v589_v2 }
  0x95   : > { %831 = vmatmul.mubr.bf16.gmra.mxu0 %v560_v11  ;;  %943 = vmatmul.mubr.bf16.gmra.mxu1 %v588_v12 }
  0x96   : > { %838 = vmatprep.mubr.bf16.mxu0 %v563_v13  ;;  %950 = vmatprep.mubr.bf16.mxu1 %v591_v14 }
  0x9d   : > { %839 = vmatmul.mubr.bf16.gmra.mxu0 %v562_v23  ;;  %951 = vmatmul.mubr.bf16.gmra.mxu1 %v590_v24 }
  0x9e   : > { %846 = vmatprep.mubr.bf16.mxu0 %v565_v25  ;;  %958 = vmatprep.mubr.bf16.mxu1 %v593_v26 }
  0xa5   : > { %847 = vmatmul.mubr.bf16.gmra.mxu0 %v564_v35  ;;  %959 = vmatmul.mubr.bf16.gmra.mxu1 %v592_v36 }
  0xa6   : > { %854 = vmatprep.mubr.bf16.mxu0 %v567_v37  ;;  %966 = vmatprep.mubr.bf16.mxu1 %v595_v38 }
  0xad   : > { %855 = vmatmul.mubr.bf16.gmra.mxu0 %v566_v47  ;;  %967 = vmatmul.mubr.bf16.gmra.mxu1 %v594_v48 }
  0xae   : > { %862 = vmatprep.mubr.bf16.mxu0 %v569_v49  ;;  %974 = vmatprep.mubr.bf16.mxu1 %v597_v50 }
  0xb5   : > { %863 = vmatmul.mubr.bf16.gmra.mxu0 %v568_v55  ;;  %975 = vmatmul.mubr.bf16.gmra.mxu1 %v596_v56 }
 0x10d   : > { %v1940_v57 = vpop.f32.mrf.mxu0  ;;  %v1942_v58 = vpop.f32.mrf.mxu1 }
 0x10e   : > { %1154 = vst [vmem:[%s1938_s13] sm:$0xff] %v1940_v57  ;;  %1182 = vst [vmem:[%s1938_s13 + $0xe0] sm:$0xff] %v1942_v58  ;;  %v1272_v52 = vmul.f32 %v1940_v57, %v1940_v57 }
 0x10f   : > { %v762_v59 = vpop.f32.mrf.mxu0  ;;  %v874_v60 = vpop.f32.mrf.mxu1 }
 0x111   : > { %v1948_v61 = vpop.f32.mrf.mxu0  ;;  %v1950_v62 = vpop.f32.mrf.mxu1 }
 0x112   : > { %1155 = vst [vmem:[%s1938_s13 + $0x8] sm:$0xff] %v1948_v61  ;;  %1183 = vst [vmem:[%s1938_s13 + $0xe8] sm:$0xff] %v1950_v62  ;;  %v1273_v49 = vmul.f32 %v1948_v61, %v1948_v61  ;;  %v1210_v53 = vadd.f32 %v1948_v61, %v1940_v57 }
 0x113   : > { %v765_v63 = vpop.f32.mrf.mxu0  ;;  %v877_v0 = vpop.f32.mrf.mxu1 }
 0x114   : > { %v1328_v59 = vadd.f32 %v1273_v49, %v1272_v52 }
 0x115   : > { %v1956_v1 = vpop.f32.mrf.mxu0  ;;  %v1958_v2 = vpop.f32.mrf.mxu1 }
 0x116   : > { %1156 = vst [vmem:[%s1938_s13 + $0x10] sm:$0xff] %v1956_v1  ;;  %1184 = vst [vmem:[%s1938_s13 + $0xf0] sm:$0xff] %v1958_v2  ;;  %v1274_v54 = vmul.f32 %v1956_v1, %v1956_v1  ;;  %v1211_v60 = vadd.f32 %v1210_v53, %v1956_v1 }
 0x117   : > { %v770_v3 = vpop.f32.mrf.mxu0  ;;  %v882_v4 = vpop.f32.mrf.mxu1 }
 0x118   : > { %v1329_v57 = vadd.f32 %v1328_v59, %v1274_v54 }
 0x119   : > { %v1964_v5 = vpop.f32.mrf.mxu0  ;;  %v1966_v6 = vpop.f32.mrf.mxu1 }
 0x11a   : > { %1157 = vst [vmem:[%s1938_s13 + $0x18] sm:$0xff] %v1964_v5  ;;  %1185 = vst [vmem:[%s1938_s13 + $0xf8] sm:$0xff] %v1966_v6  ;;  %v1275_v63 = vmul.f32 %v1964_v5, %v1964_v5  ;;  %v1212_v61 = vadd.f32 %v1211_v60, %v1964_v5 }
 0x11b   : > { %v773_v7 = vpop.f32.mrf.mxu0  ;;  %v885_v8 = vpop.f32.mrf.mxu1 }
 0x11c   : > { %v1330_v8 = vadd.f32 %v1329_v57, %v1275_v63 }
 0x11d   : > { %v1972_v9 = vpop.f32.mrf.mxu0  ;;  %v1974_v10 = vpop.f32.mrf.mxu1 }
 0x11e   : > { %1158 = vst [vmem:[%s1938_s13 + $0x20] sm:$0xff] %v1972_v9  ;;  %1186 = vst [vmem:[%s1938_s13 + $0x100] sm:$0xff] %v1974_v10  ;;  %v1276_v4 = vmul.f32 %v1972_v9, %v1972_v9 }
 0x11f   : > { %v778_v11 = vpop.f32.mrf.mxu0  ;;  %v890_v12 = vpop.f32.mrf.mxu1 }
 0x120   : > { %v1213_v11 = vadd.f32 %v1212_v61, %v1972_v9  ;;  %v1331_v5 = vadd.f32 %v1330_v8, %v1276_v4 }
 0x121   : > { %v1980_v13 = vpop.f32.mrf.mxu0  ;;  %v1982_v14 = vpop.f32.mrf.mxu1 }
 0x122   : > { %1159 = vst [vmem:[%s1938_s13 + $0x28] sm:$0xff] %v1980_v13  ;;  %1187 = vst [vmem:[%s1938_s13 + $0x108] sm:$0xff] %v1982_v14  ;;  %v1277_v12 = vmul.f32 %v1980_v13, %v1980_v13 }
 0x123   : > { %v781_v15 = vpop.f32.mrf.mxu0  ;;  %v893_v16 = vpop.f32.mrf.mxu1 }
 0x125   : > { %v1988_v17 = vpop.f32.mrf.mxu0  ;;  %v1990_v18 = vpop.f32.mrf.mxu1 }
 0x126   : > { %1160 = vst [vmem:[%s1938_s13 + $0x30] sm:$0xff] %v1988_v17  ;;  %1188 = vst [vmem:[%s1938_s13 + $0x110] sm:$0xff] %v1990_v18 }
 0x127   : > { %v786_v19 = vpop.f32.mrf.mxu0  ;;  %v898_v20 = vpop.f32.mrf.mxu1 }
 0x128   : > { %v1214_v19 = vadd.f32 %v1213_v11, %v1980_v13  ;;  %v1278_v20 = vmul.f32 %v1988_v17, %v1988_v17 }
 0x129   : > { %v1996_v21 = vpop.f32.mrf.mxu0  ;;  %v1998_v22 = vpop.f32.mrf.mxu1 }
 0x12a   : > { %1161 = vst [vmem:[%s1938_s13 + $0x38] sm:$0xff] %v1996_v21  ;;  %1189 = vst [vmem:[%s1938_s13 + $0x118] sm:$0xff] %v1998_v22 }
 0x12b   : > { %v789_v23 = vpop.f32.mrf.mxu0  ;;  %v901_v24 = vpop.f32.mrf.mxu1 }
 0x12c   : > { %v1332_v24 = vadd.f32 %v1331_v5, %v1277_v12 }
 0x12d   : > { %v2004_v25 = vpop.f32.mrf.mxu0  ;;  %v2006_v26 = vpop.f32.mrf.mxu1 }
 0x12e   : > { %1162 = vst [vmem:[%s1938_s13 + $0x40] sm:$0xff] %v2004_v25  ;;  %1190 = vst [vmem:[%s1938_s13 + $0x120] sm:$0xff] %v2006_v26  ;;  %v1333_v13 = vadd.f32 %v1332_v24, %v1278_v20 }
 0x12f   : > { %v794_v27 = vpop.f32.mrf.mxu0  ;;  %v906_v28 = vpop.f32.mrf.mxu1 }
 0x130   : > { %v1215_v27 = vadd.f32 %v1214_v19, %v1988_v17  ;;  %v1279_v28 = vmul.f32 %v1996_v21, %v1996_v21 }
 0x131   : > { %v2012_v29 = vpop.f32.mrf.mxu0  ;;  %v2014_v30 = vpop.f32.mrf.mxu1 }
 0x132   : > { %1163 = vst [vmem:[%s1938_s13 + $0x48] sm:$0xff] %v2012_v29  ;;  %1191 = vst [vmem:[%s1938_s13 + $0x128] sm:$0xff] %v2014_v30 }
 0x133   : > { %v797_v31 = vpop.f32.mrf.mxu0  ;;  %v909_v32 = vpop.f32.mrf.mxu1 }
 0x135   : > { %v2020_v33 = vpop.f32.mrf.mxu0  ;;  %v2022_v34 = vpop.f32.mrf.mxu1 }
 0x136   : > { %1164 = vst [vmem:[%s1938_s13 + $0x50] sm:$0xff] %v2020_v33  ;;  %1192 = vst [vmem:[%s1938_s13 + $0x130] sm:$0xff] %v2022_v34  ;;  %v1282_v52 = vmul.f32 %v2020_v33, %v2020_v33 }
 0x137   : > { %v802_v35 = vpop.f32.mrf.mxu0  ;;  %v914_v36 = vpop.f32.mrf.mxu1 }
 0x138   : > { %v1216_v35 = vadd.f32 %v1215_v27, %v1996_v21  ;;  %v1280_v36 = vmul.f32 %v2004_v25, %v2004_v25 }
 0x139   : > { %v2028_v37 = vpop.f32.mrf.mxu0  ;;  %v2030_v38 = vpop.f32.mrf.mxu1 }
 0x13a   : > { %1165 = vst [vmem:[%s1938_s13 + $0x58] sm:$0xff] %v2028_v37  ;;  %1193 = vst [vmem:[%s1938_s13 + $0x138] sm:$0xff] %v2030_v38 }
 0x13b   : > { %v805_v39 = vpop.f32.mrf.mxu0  ;;  %v917_v40 = vpop.f32.mrf.mxu1 }
 0x13c   : > { %v1334_v40 = vadd.f32 %v1333_v13, %v1279_v28 }
 0x13d   : > { %v2036_v41 = vpop.f32.mrf.mxu0  ;;  %v2038_v42 = vpop.f32.mrf.mxu1 }
 0x13e   : > { %1166 = vst [vmem:[%s1938_s13 + $0x60] sm:$0xff] %v2036_v41  ;;  %1194 = vst [vmem:[%s1938_s13 + $0x140] sm:$0xff] %v2038_v42  ;;  %v1335_v21 = vadd.f32 %v1334_v40, %v1280_v36  ;;  %v1284_v57 = vmul.f32 %v2036_v41, %v2036_v41 }
 0x13f   : > { %v810_v43 = vpop.f32.mrf.mxu0  ;;  %v922_v44 = vpop.f32.mrf.mxu1 }
 0x140   : > { %v1217_v43 = vadd.f32 %v1216_v35, %v2004_v25  ;;  %v1281_v44 = vmul.f32 %v2012_v29, %v2012_v29 }
 0x141   : > { %v2044_v45 = vpop.f32.mrf.mxu0  ;;  %v2046_v46 = vpop.f32.mrf.mxu1 }
 0x142   : > { %1167 = vst [vmem:[%s1938_s13 + $0x68] sm:$0xff] %v2044_v45  ;;  %1195 = vst [vmem:[%s1938_s13 + $0x148] sm:$0xff] %v2046_v46  ;;  %v1218_v49 = vadd.f32 %v1217_v43, %v2012_v29  ;;  %v1336_v25 = vadd.f32 %v1335_v21, %v1281_v44 }
 0x143   : > { %v813_v47 = vpop.f32.mrf.mxu0  ;;  %v925_v48 = vpop.f32.mrf.mxu1 }
 0x144   : > { %v1337_v63 = vadd.f32 %v1336_v25, %v1282_v52 }
 0x145   : > { %v2054_v50 = vpop.f32.mrf.mxu0  ;;  %v2056_v51 = vpop.f32.mrf.mxu1 }
 0x146   : > { %1168 = vst [vmem:[%s1938_s13 + $0x70] sm:$0xff] %v2054_v50  ;;  %1196 = vst [vmem:[%s1938_s13 + $0x150] sm:$0xff] %v2056_v51  ;;  %v1286_v5 = vmul.f32 %v2054_v50, %v2054_v50 }
 0x147   : > { %v818_v55 = vpop.f32.mrf.mxu0  ;;  %v930_v56 = vpop.f32.mrf.mxu1 }
 0x148   : > { %v1219_v55 = vadd.f32 %v1218_v49, %v2020_v33  ;;  %v1283_v56 = vmul.f32 %v2028_v37, %v2028_v37 }
 0x149   : > { %v2071_v0 = vpop.f32.mrf.mxu0  ;;  %v2073_v3 = vpop.f32.mrf.mxu1 }
 0x14a   : > { %1169 = vst [vmem:[%s1938_s13 + $0x78] sm:$0xff] %v2071_v0  ;;  %1197 = vst [vmem:[%s1938_s13 + $0x158] sm:$0xff] %v2073_v3  ;;  %v1220_v29 = vadd.f32 %v1219_v55, %v2028_v37  ;;  %v1338_v33 = vadd.f32 %v1337_v63, %v1283_v56 }
 0x14b   : > { %v821_v1 = vpop.f32.mrf.mxu0  ;;  %v933_v7 = vpop.f32.mrf.mxu1 }
 0x14c   : > { %v1221_v1 = vadd.f32 %v1220_v29, %v2036_v41  ;;  %v1285_v7 = vmul.f32 %v2044_v45, %v2044_v45  ;;  %v1339_v12 = vadd.f32 %v1338_v33, %v1284_v57 }
 0x14d   : > { %v2085_v15 = vpop.f32.mrf.mxu0  ;;  %v2087_v16 = vpop.f32.mrf.mxu1 }
 0x14e   : > { %1170 = vst [vmem:[%s1938_s13 + $0x80] sm:$0xff] %v2085_v15  ;;  %1198 = vst [vmem:[%s1938_s13 + $0x160] sm:$0xff] %v2087_v16  ;;  %v1222_v37 = vadd.f32 %v1221_v1, %v2044_v45  ;;  %v1340_v41 = vadd.f32 %v1339_v12, %v1285_v7  ;;  %v1288_v13 = vmul.f32 %v2085_v15, %v2085_v15 }
 0x14f   : > { %v826_v9 = vpop.f32.mrf.mxu0  ;;  %v938_v23 = vpop.f32.mrf.mxu1 }
 0x150   : > { %v1223_v9 = vadd.f32 %v1222_v37, %v2054_v50  ;;  %v1287_v23 = vmul.f32 %v2071_v0, %v2071_v0  ;;  %v1341_v28 = vadd.f32 %v1340_v41, %v1286_v5 }
 0x151   : > { %v2099_v31 = vpop.f32.mrf.mxu0  ;;  %v2101_v32 = vpop.f32.mrf.mxu1 }
 0x152   : > { %1171 = vst [vmem:[%s1938_s13 + $0x88] sm:$0xff] %v2099_v31  ;;  %1199 = vst [vmem:[%s1938_s13 + $0x168] sm:$0xff] %v2101_v32  ;;  %v1224_v45 = vadd.f32 %v1223_v9, %v2071_v0  ;;  %v1342_v50 = vadd.f32 %v1341_v28, %v1287_v23 }
 0x153   : > { %v829_v17 = vpop.f32.mrf.mxu0  ;;  %v941_v39 = vpop.f32.mrf.mxu1 }
 0x154   : > { %v1225_v17 = vadd.f32 %v1224_v45, %v2085_v15  ;;  %v1289_v39 = vmul.f32 %v2099_v31, %v2099_v31  ;;  %v1343_v44 = vadd.f32 %v1342_v50, %v1288_v13 }
 0x155   : > { %v832_v47 = vpop.f32.mrf.mxu0  ;;  %v2113_v48 = vpop.f32.mrf.mxu1 }
 0x156   : > { %1172 = vst [vmem:[%s1938_s13 + $0x90] sm:$0xff] %v832_v47  ;;  %1200 = vst [vmem:[%s1938_s13 + $0x170] sm:$0xff] %v2113_v48  ;;  %v1226_v0 = vadd.f32 %v1225_v17, %v2099_v31  ;;  %v1290_v21 = vmul.f32 %v832_v47, %v832_v47 }
 0x157   : > { %v834_v53 = vpop.f32.mrf.mxu0  ;;  %v946_v54 = vpop.f32.mrf.mxu1 }
 0x158   : > { %v1344_v53 = vadd.f32 %v1343_v44, %v1289_v39  ;;  %v1227_v54 = vadd.f32 %v1226_v0, %v832_v47 }
 0x159   : > { %v835_v59 = vpop.f32.mrf.mxu0  ;;  %v2124_v60 = vpop.f32.mrf.mxu1 }
 0x15a   : > { %1173 = vst [vmem:[%s1938_s13 + $0x98] sm:$0xff] %v835_v59  ;;  %1201 = vst [vmem:[%s1938_s13 + $0x178] sm:$0xff] %v2124_v60  ;;  %v1291_v15 = vmul.f32 %v835_v59, %v835_v59  ;;  %v1345_v56 = vadd.f32 %v1344_v53, %v1290_v21  ;;  %v1228_v63 = vadd.f32 %v1227_v54, %v835_v59 }
 0x15b   : > { %v837_v61 = vpop.f32.mrf.mxu0  ;;  %v949_v4 = vpop.f32.mrf.mxu1 }
 0x15c   : > { %v1346_v61 = vadd.f32 %v1345_v56, %v1291_v15 }
 0x15d   : > { %v840_v8 = vpop.f32.mrf.mxu0  ;;  %v2135_v11 = vpop.f32.mrf.mxu1 }
 0x15e   : > { %1174 = vst [vmem:[%s1938_s13 + $0xa0] sm:$0xff] %v840_v8  ;;  %1202 = vst [vmem:[%s1938_s13 + $0x180] sm:$0xff] %v2135_v11  ;;  %v1292_v29 = vmul.f32 %v840_v8, %v840_v8  ;;  %v1229_v4 = vadd.f32 %v1228_v63, %v840_v8 }
 0x15f   : > { %v842_v19 = vpop.f32.mrf.mxu0  ;;  %v954_v20 = vpop.f32.mrf.mxu1 }
 0x160   : > { %v1347_v47 = vadd.f32 %v1346_v61, %v1292_v29 }
 0x161   : > { %v843_v24 = vpop.f32.mrf.mxu0  ;;  %v2146_v27 = vpop.f32.mrf.mxu1 }
 0x162   : > { %1175 = vst [vmem:[%s1938_s13 + $0xa8] sm:$0xff] %v843_v24  ;;  %1203 = vst [vmem:[%s1938_s13 + $0x188] sm:$0xff] %v2146_v27  ;;  %v1293_v33 = vmul.f32 %v843_v24, %v843_v24  ;;  %v1230_v12 = vadd.f32 %v1229_v4, %v843_v24 }
 0x163   : > { %v845_v35 = vpop.f32.mrf.mxu0  ;;  %v957_v36 = vpop.f32.mrf.mxu1 }
 0x164   : > { %v1348_v19 = vadd.f32 %v1347_v47, %v1293_v33  ;;  %v1301_v33 = vmul.f32 %v1950_v62, %v1950_v62 }
 0x165   : > { %v848_v40 = vpop.f32.mrf.mxu0  ;;  %v2157_v43 = vpop.f32.mrf.mxu1 }
 0x166   : > { %1176 = vst [vmem:[%s1938_s13 + $0xb0] sm:$0xff] %v848_v40  ;;  %1204 = vst [vmem:[%s1938_s13 + $0x190] sm:$0xff] %v2157_v43  ;;  %v1294_v37 = vmul.f32 %v848_v40, %v848_v40  ;;  %v1231_v20 = vadd.f32 %v1230_v12, %v848_v40  ;;  %v1302_v12 = vmul.f32 %v1958_v2, %v1958_v2 }
 0x167   : > { %v850_v49 = vpop.f32.mrf.mxu0  ;;  %v962_v52 = vpop.f32.mrf.mxu1 }
 0x168   : > { %v1349_v23 = vadd.f32 %v1348_v19, %v1294_v37 }
 0x169   : > { %v851_v25 = vpop.f32.mrf.mxu0  ;;  %v2163_v55 = vpop.f32.mrf.mxu1 }
 0x16a   : > { %1177 = vst [vmem:[%s1938_s13 + $0xb8] sm:$0xff] %v851_v25  ;;  %1205 = vst [vmem:[%s1938_s13 + $0x198] sm:$0xff] %v2163_v55  ;;  %v1295_v41 = vmul.f32 %v851_v25, %v851_v25  ;;  %v1232_v28 = vadd.f32 %v1231_v20, %v851_v25 }
 0x16b   : > { %v853_v31 = vpop.f32.mrf.mxu0  ;;  %v965_v57 = vpop.f32.mrf.mxu1 }
 0x16c   : > { %v1350_v35 = vadd.f32 %v1349_v23, %v1295_v41  ;;  %v1300_v57 = vmul.f32 %v1942_v58, %v1942_v58 }
 0x16d   : > { %v856_v1 = vpop.f32.mrf.mxu0  ;;  %v2168_v7 = vpop.f32.mrf.mxu1 }
 0x16e   : > { %1178 = vst [vmem:[%s1938_s13 + $0xc0] sm:$0xff] %v856_v1  ;;  %1206 = vst [vmem:[%s1938_s13 + $0x1a0] sm:$0xff] %v2168_v7  ;;  %v1296_v45 = vmul.f32 %v856_v1, %v856_v1  ;;  %v1233_v36 = vadd.f32 %v1232_v28, %v856_v1 }
 0x16f   : > { %v858_v59 = vpop.f32.mrf.mxu0  ;;  %v970_v5 = vpop.f32.mrf.mxu1 }
 0x170   : > { %v1351_v40 = vadd.f32 %v1350_v35, %v1296_v45  ;;  %v1303_v5 = vmul.f32 %v1966_v6, %v1966_v6 }
 0x171   : > { %v859_v9 = vpop.f32.mrf.mxu0  ;;  %v2173_v8 = vpop.f32.mrf.mxu1 }
 0x172   : > { %1179 = vst [vmem:[%s1938_s13 + $0xc8] sm:$0xff] %v859_v9  ;;  %1207 = vst [vmem:[%s1938_s13 + $0x1a8] sm:$0xff] %v2173_v8  ;;  %v1297_v50 = vmul.f32 %v859_v9, %v859_v9  ;;  %v1234_v44 = vadd.f32 %v1233_v36, %v859_v9 }
 0x173   : > { %v861_v24 = vpop.f32.mrf.mxu0  ;;  %v973_v13 = vpop.f32.mrf.mxu1 }
 0x174   : > { %v1352_v52 = vadd.f32 %v1351_v40, %v1297_v50 }
 0x175   : > { %v864_v17 = vpop.f32.mrf.mxu0  ;;  %v2178_v39 = vpop.f32.mrf.mxu1 }
 0x176   : > { %1180 = vst [vmem:[%s1938_s13 + $0xd0] sm:$0xff] %v864_v17  ;;  %v1298_v0 = vmul.f32 %v864_v17, %v864_v17  ;;  %1208 = vst [vmem:[%s1938_s13 + $0x1b0] sm:$0xff] %v2178_v39  ;;  %v1235_v53 = vadd.f32 %v1234_v44, %v864_v17 }
 0x177   : > { %v866_v21 = vpop.f32.mrf.mxu0  ;;  %v978_v49 = vpop.f32.mrf.mxu1 }
 0x178   : > { %v1353_v25 = vadd.f32 %v1352_v52, %v1298_v0 }
 0x179   : > { %v867_v54 = vpop.f32.mrf.mxu0  ;;  %v2183_v15 = vpop.f32.mrf.mxu1 }
 0x17a   : > { %1181 = vst [vmem:[%s1938_s13 + $0xd8] sm:$0xff] %v867_v54  ;;  %v1236_v56 = vadd.f32 %v1235_v53, %v867_v54  ;;  %v1299_v63 = vmul.f32 %v867_v54, %v867_v54  ;;  %1209 = vst [vmem:[%s1938_s13 + $0x1b8] sm:$0xff] %v2183_v15 }
 0x17b   : > { %v869_v29 = vpop.f32.mrf.mxu0  ;;  %v981_v31 = vpop.f32.mrf.mxu1 }
 0x17c   : > { %v1237_v61 = vadd.f32 %v1236_v56, %v1942_v58  ;;  %v1354_v4 = vadd.f32 %v1353_v25, %v1299_v63  ;;  %v1304_v58 = vmul.f32 %v1974_v10, %v1974_v10  ;;  %v1315_v29 = vmul.f32 %v2073_v3, %v2073_v3 }
 0x17e   : > { %v1238_v1 = vadd.f32 %v1237_v61, %v1950_v62  ;;  %v1355_v47 = vadd.f32 %v1354_v4, %v1300_v57  ;;  %v1305_v62 = vmul.f32 %v1982_v14, %v1982_v14  ;;  %v1316_v61 = vmul.f32 %v2087_v16, %v2087_v16 }
 0x180   : > { %v1239_v37 = vadd.f32 %v1238_v1, %v1958_v2  ;;  %v1356_v59 = vadd.f32 %v1355_v47, %v1301_v33  ;;  %v1306_v2 = vmul.f32 %v1990_v18, %v1990_v18  ;;  %v1317_v33 = vmul.f32 %v2101_v32, %v2101_v32 }
 0x181   : > { %v1318_v47 = vmul.f32 %v2113_v48, %v2113_v48 }
 0x182   : > { %v1240_v19 = vadd.f32 %v1239_v37, %v1966_v6  ;;  %v1357_v20 = vadd.f32 %v1356_v59, %v1302_v12  ;;  %v1307_v6 = vmul.f32 %v1998_v22, %v1998_v22  ;;  %v1319_v37 = vmul.f32 %v2124_v60, %v2124_v60 }
 0x184   : > { %v1241_v41 = vadd.f32 %v1240_v19, %v1974_v10  ;;  %v1358_v9 = vadd.f32 %v1357_v20, %v1303_v5  ;;  %v1308_v10 = vmul.f32 %v2006_v26, %v2006_v26  ;;  %v1320_v5 = vmul.f32 %v2135_v11, %v2135_v11 }
 0x185   : > { %v1321_v20 = vmul.f32 %v2146_v27, %v2146_v27 }
 0x186   : > { %v1242_v23 = vadd.f32 %v1241_v41, %v1982_v14  ;;  %v1359_v28 = vadd.f32 %v1358_v9, %v1304_v58  ;;  %v1309_v14 = vmul.f32 %v2014_v30, %v2014_v30  ;;  %v1322_v41 = vmul.f32 %v2157_v43, %v2157_v43 }
 0x188   : > { %v1243_v45 = vadd.f32 %v1242_v23, %v1990_v18  ;;  %v1360_v24 = vadd.f32 %v1359_v28, %v1305_v62  ;;  %v1310_v18 = vmul.f32 %v2022_v34, %v2022_v34  ;;  %v1323_v62 = vmul.f32 %v2163_v55, %v2163_v55 }
 0x189   : > { %v1324_v28 = vmul.f32 %v2168_v7, %v2168_v7 }
 0x18a   : > { %v1361_v13 = vadd.f32 %v1360_v24, %v1306_v2  ;;  %v1244_v35 = vadd.f32 %v1243_v45, %v1998_v22  ;;  %v1311_v22 = vmul.f32 %v2030_v38, %v2030_v38 }
 0x18c   : > { %v1245_v36 = vadd.f32 %v1244_v35, %v2006_v26  ;;  %v1362_v50 = vadd.f32 %v1361_v13, %v1307_v6  ;;  %v1312_v26 = vmul.f32 %v2038_v42, %v2038_v42  ;;  %v1326_v6 = vmul.f32 %v2178_v39, %v2178_v39 }
 0x18d   : > { %v1327_v35 = vmul.f32 %v2183_v15, %v2183_v15 }
 0x18e   : > { %v1246_v17 = vadd.f32 %v1245_v36, %v2014_v30  ;;  %v1363_v40 = vadd.f32 %v1362_v50, %v1308_v10  ;;  %v1313_v30 = vmul.f32 %v2046_v46, %v2046_v46 }
 0x190   : > { %v1247_v44 = vadd.f32 %v1246_v17, %v2022_v34  ;;  %v1364_v0 = vadd.f32 %v1363_v40, %v1309_v14  ;;  %v1314_v34 = vmul.f32 %v2056_v51, %v2056_v51 }
 0x192   : > { %v1248_v21 = vadd.f32 %v1247_v44, %v2030_v38  ;;  %v1365_v49 = vadd.f32 %v1364_v0, %v1310_v18 }
 0x194   : > { %v1249_v52 = vadd.f32 %v1248_v21, %v2038_v42  ;;  %v1366_v53 = vadd.f32 %v1365_v49, %v1311_v22 }
 0x196   : > { %v1250_v54 = vadd.f32 %v1249_v52, %v2046_v46  ;;  %v1367_v25 = vadd.f32 %v1366_v53, %v1312_v26 }
 0x198   : > { %v1251_v56 = vadd.f32 %v1250_v54, %v2056_v51  ;;  %v1368_v63 = vadd.f32 %v1367_v25, %v1313_v30 }
 0x19a   : > { %v1252_v38 = vadd.f32 %v1251_v56, %v2073_v3  ;;  %v1369_v31 = vadd.f32 %v1368_v63, %v1314_v34 }
 0x19c   : > { %v1370_v42 = vadd.f32 %v1369_v31, %v1315_v29  ;;  %v1253_v57 = vadd.f32 %v1252_v38, %v2087_v16 }
 0x19e   : > { %v1371_v46 = vadd.f32 %v1370_v42, %v1316_v61  ;;  %v1254_v4 = vadd.f32 %v1253_v57, %v2101_v32 }
 0x1a0   : > { %v1372_v51 = vadd.f32 %v1371_v46, %v1317_v33  ;;  %v1255_v1 = vadd.f32 %v1254_v4, %v2113_v48 }
 0x1a2   : > { %v1373_v3 = vadd.f32 %v1372_v51, %v1318_v47  ;;  %v1256_v12 = vadd.f32 %v1255_v1, %v2124_v60 }
 0x1a4   : > { %v1374_v59 = vadd.f32 %v1373_v3, %v1319_v37  ;;  %v1257_v16 = vadd.f32 %v1256_v12, %v2135_v11 }
 0x1a6   : > { %v1375_v19 = vadd.f32 %v1374_v59, %v1320_v5  ;;  %v1258_v32 = vadd.f32 %v1257_v16, %v2146_v27 }
 0x1a8   : > { %v1376_v58 = vadd.f32 %v1375_v19, %v1321_v20  ;;  %v1259_v48 = vadd.f32 %v1258_v32, %v2157_v43  ;;  %v1325_v43 = vmul.f32 %v2173_v8, %v2173_v8 }
 0x1aa   : > { %v1377_v9 = vadd.f32 %v1376_v58, %v1322_v41  ;;  %v1260_v60 = vadd.f32 %v1259_v48, %v2163_v55 }
 0x1ac   : > { %v1378_v11 = vadd.f32 %v1377_v9, %v1323_v62  ;;  %v1261_v23 = vadd.f32 %v1260_v60, %v2168_v7 }
 0x1ae   : > { %v1379_v27 = vadd.f32 %v1378_v11, %v1324_v28  ;;  %v1262_v2 = vadd.f32 %v1261_v23, %v2173_v8 }
 0x1b0   : > { %v1380_v45 = vadd.f32 %v1379_v27, %v1325_v43  ;;  %v1263_v24 = vadd.f32 %v1262_v2, %v2178_v39 }
 0x1b2   : > { %v1381_v55 = vadd.f32 %v1380_v45, %v1326_v6  ;;  %v1264_v13 = vadd.f32 %v1263_v24, %v2183_v15 }
 0x1b4   : > { %v1265_v7 = vrot.slane %v1264_v13, 4  ;;  %v1382_v10 = vadd.f32 %v1381_v55, %v1327_v35 }
 0x1b6   : > { %v1266_v36 = vadd.f32 %v1265_v7, %v1264_v13  ;;  %v1383_v50 = vrot.slane %v1382_v10, 4 }
 0x1b8   : > { %v1267_v14 = vrot.slane %v1266_v36, 2  ;;  %v1384_v17 = vadd.f32 %v1383_v50, %v1382_v10 }
 0x1ba   : > { %v1268_v8 = vadd.f32 %v1267_v14, %v1266_v36  ;;  %v1385_v40 = vrot.slane %v1384_v17, 2 }
 0x1bc   : > { %v1269_v18 = vrot.slane %v1268_v8, 1  ;;  %v1386_v44 = vadd.f32 %v1385_v40, %v1384_v17 }
 0x1be   : > { %v1270_v39 = vadd.f32 %v1269_v18, %v1268_v8  ;;  %v1387_v0 = vrot.slane %v1386_v44, 1 }
 0x1c0   : > { %1271 = vst [vmem:[%s306_s14] sm:$0x1] %v1270_v39  ;;  %v1388_v15 = vadd.f32 %v1387_v0, %v1386_v44 }
 0x1c2   : > { %1389 = vst [vmem:[%s312_s22] sm:$0x1] %v1388_v15 }
 0x1c3 PF: > { %s15_s17 = sadd.s32 1, %s1685_s17   ;;  %s2294_s15 = smov %s1681_s16 }
 0x1c4   : > { %p12_p6 = scmp.ge.s32.totalorder %s15_s17, 30   ;;  %s2295_s16 = smov %s2297_s18 }
 0x1c6   :  { %14 = sbr.rel (!%p12_p6) target bundleno = 2 (0x2), region = 93 }

// kernel: conv_bn_relu.3
= control target key start
LH: loop header
LB: loop body
LE: loop exit
PB: predicated region body
PF: predicated region fallthrough
CT: control target
= control target key end

     0   :  { %s571_s12 = smov 0   ;;  %s826_s0 = inlined_call_operand.vmem [shape: f32[12544,128], index: 0, kind: input, shape index: {}]   ;;  %s827_s1 = inlined_call_operand.vmem [shape: f32[1,128], index: 1, kind: input, shape index: {}]   ;;  %s828_s2 = inlined_call_operand.vmem [shape: f32[1,128], index: 2, kind: input, shape index: {}]   ;;  %s829_s3 = inlined_call_operand.vmem [shape: f32[12544,128], index: 3, kind: output, shape index: {}]  }
   0x1 LB: > { %s524_s13 = sadd.s32 4294967295, %s549_s12   ;;  %p528_p0 = scmp.ge.s32.totalorder %s549_s12, 1  ;;  %s549_s12 = sphi %s571_s12, %s13_s12  }
   0x2   : > { %p138_p1 = scmp.lt.s32.totalorder %s549_s12, 29 }
   0x4   : > { %p139_p2 = pnand %p528_p0, %p138_p1 }
   0x5   : > { %s162_s14 = smul.u32 (!%p139_p2), 56, %s524_s13 }
   0x6   : > { %142 = sbr.rel (%p139_p2) target bundleno = 62 (0x3e), region = 32 }
   0x7   : > { %p163_p3 = scmp.lt.s32.totalorder (!%p139_p2), %s162_s14, 1567 }
   0xb   : > { %s831_s14 = smov (!%p163_p3, %s162_s14), 1567  ;;  %v582_v0 = vld [vmem:[%s827_s1] ss:$0 sm:$0xff] }
   0xc   : > { %s529_s15 = sshll.u32 %s831_s14, 3  ;;  %v592_v1 = vld [vmem:[%s828_s2] ss:$0 sm:$0xff] }
   0xd   : > { %s587_s20 = scalar_lea.vmem %s826_s0, %s529_s15  ;;  %s615_s25 = scalar_lea.vmem %s829_s3, %s529_s15 }
   0xe   : > { %v174_v2 = vld [vmem:[%s587_s20] sm:$0xff]  ;;  %v175_v3 = vld [vmem:[%s587_s20 + $0x8] sm:$0xff]  ;;  %v176_v4 = vld [vmem:[%s587_s20 + $0x10] sm:$0xff] }
   0xf   : > { %v237_v5 = vmul.f32 %v582_v0, %v174_v2  ;;  %v238_v6 = vmul.f32 %v582_v0, %v175_v3  ;;  %v239_v7 = vmul.f32 %v582_v0, %v176_v4  ;;  %v177_v8 = vld [vmem:[%s587_s20 + $0x18] sm:$0xff]  ;;  %v178_v9 = vld [vmem:[%s587_s20 + $0x20] sm:$0xff]  ;;  %v179_v10 = vld [vmem:[%s587_s20 + $0x28] sm:$0xff] }
  0x10   : > { %v240_v11 = vmul.f32 %v582_v0, %v177_v8  ;;  %v241_v12 = vmul.f32 %v582_v0, %v178_v9  ;;  %v242_v13 = vmul.f32 %v582_v0, %v179_v10  ;;  %v180_v14 = vld [vmem:[%s587_s20 + $0x30] sm:$0xff]  ;;  %v181_v15 = vld [vmem:[%s587_s20 + $0x38] sm:$0xff]  ;;  %v182_v24 = vld [vmem:[%s587_s20 + $0x40] sm:$0xff] }
  0x11   : > { %v300_v16 = vadd.f32 %v592_v1, %v237_v5  ;;  %v301_v17 = vadd.f32 %v592_v1, %v238_v6  ;;  %v302_v18 = vadd.f32 %v592_v1, %v239_v7  ;;  %v243_v19 = vmul.f32 %v582_v0, %v180_v14  ;;  %v183_v25 = vld [vmem:[%s587_s20 + $0x48] sm:$0xff]  ;;  %v184_v26 = vld [vmem:[%s587_s20 + $0x50] sm:$0xff]  ;;  %v185_v31 = vld [vmem:[%s587_s20 + $0x58] sm:$0xff] }
  0x12   : > { %v303_v20 = vadd.f32 %v592_v1, %v240_v11  ;;  %v304_v21 = vadd.f32 %v592_v1, %v241_v12  ;;  %v305_v22 = vadd.f32 %v592_v1, %v242_v13  ;;  %v244_v23 = vmul.f32 %v582_v0, %v181_v15  ;;  %v186_v32 = vld [vmem:[%s587_s20 + $0x60] sm:$0xff]  ;;  %v187_v33 = vld [vmem:[%s587_s20 + $0x68] sm:$0xff]  ;;  %v188_v38 = vld [vmem:[%s587_s20 + $0x70] sm:$0xff] }
  0x13   : > { %v356_v27 = vmax.f32 %v300_v16, 0.0  ;;  %v357_v28 = vmax.f32 %v301_v17, 0.0  ;;  %v358_v29 = vmax.f32 %v302_v18, 0.0  ;;  %v306_v30 = vadd.f32 %v592_v1, %v243_v19  ;;  %v189_v43 = vld [vmem:[%s587_s20 + $0x78] sm:$0xff]  ;;  %v190_v56 = vld [vmem:[%s587_s20 + $0x80] sm:$0xff]  ;;  %v191_v57 = vld [vmem:[%s587_s20 + $0x88] sm:$0xff] }
  0x14   : > { %v359_v34 = vmax.f32 %v303_v20, 0.0  ;;  %v360_v35 = vmax.f32 %v304_v21, 0.0  ;;  %v361_v36 = vmax.f32 %v305_v22, 0.0  ;;  %v307_v37 = vadd.f32 %v592_v1, %v244_v23  ;;  %v192_v58 = vld [vmem:[%s587_s20 + $0x90] sm:$0xff]  ;;  %v193_v63 = vld [vmem:[%s587_s20 + $0x98] sm:$0xff]  ;;  %v194_v2 = vld [vmem:[%s587_s20 + $0xa0] sm:$0xff] }
  0x15   : > { %412 = vst [vmem:[%s615_s25] sm:$0xff] %v356_v27  ;;  %413 = vst [vmem:[%s615_s25 + $0x8] sm:$0xff] %v357_v28  ;;  %v362_v39 = vmax.f32 %v306_v30, 0.0  ;;  %v245_v40 = vmul.f32 %v582_v0, %v182_v24  ;;  %v246_v41 = vmul.f32 %v582_v0, %v183_v25  ;;  %v247_v42 = vmul.f32 %v582_v0, %v184_v26  ;;  %v195_v3 = vld [vmem:[%s587_s20 + $0xa8] sm:$0xff]  ;;  %v196_v8 = vld [vmem:[%s587_s20 + $0xb0] sm:$0xff] }
  0x16   : > { %414 = vst [vmem:[%s615_s25 + $0x10] sm:$0xff] %v358_v29  ;;  %415 = vst [vmem:[%s615_s25 + $0x18] sm:$0xff] %v359_v34  ;;  %v363_v44 = vmax.f32 %v307_v37, 0.0  ;;  %v248_v45 = vmul.f32 %v582_v0, %v185_v31  ;;  %v249_v46 = vmul.f32 %v582_v0, %v186_v32  ;;  %v250_v47 = vmul.f32 %v582_v0, %v187_v33  ;;  %v197_v13 = vld [vmem:[%s587_s20 + $0xb8] sm:$0xff]  ;;  %v198_v26 = vld [vmem:[%s587_s20 + $0xc0] sm:$0xff] }
  0x17   : > { %416 = vst [vmem:[%s615_s25 + $0x20] sm:$0xff] %v360_v35  ;;  %417 = vst [vmem:[%s615_s25 + $0x28] sm:$0xff] %v361_v36  ;;  %v308_v48 = vadd.f32 %v592_v1, %v245_v40  ;;  %v309_v49 = vadd.f32 %v592_v1, %v246_v41  ;;  %v310_v50 = vadd.f32 %v592_v1, %v247_v42  ;;  %v199_v27 = vld [vmem:[%s587_s20 + $0xc8] sm:$0xff]  ;;  %v200_v28 = vld [vmem:[%s587_s20 + $0xd0] sm:$0xff] }
  0x18   : > { %418 = vst [vmem:[%s615_s25 + $0x30] sm:$0xff] %v362_v39  ;;  %v251_v51 = vmul.f32 %v582_v0, %v188_v38  ;;  %419 = vst [vmem:[%s615_s25 + $0x38] sm:$0xff] %v363_v44  ;;  %v311_v52 = vadd.f32 %v592_v1, %v248_v45  ;;  %v312_v53 = vadd.f32 %v592_v1, %v249_v46  ;;  %v201_v33 = vld [vmem:[%s587_s20 + $0xd8] sm:$0xff]  ;;  %v202_v34 = vld [vmem:[%s587_s20 + $0xe0] sm:$0xff] }
  0x19   : > { %v313_v54 = vadd.f32 %v592_v1, %v250_v47  ;;  %v252_v55 = vmul.f32 %v582_v0, %v189_v43  ;;  %v364_v59 = vmax.f32 %v308_v48, 0.0  ;;  %v365_v60 = vmax.f32 %v309_v49, 0.0  ;;  %v203_v35 = vld [vmem:[%s587_s20 + $0xe8] sm:$0xff]  ;;  %v204_v40 = vld [vmem:[%s587_s20 + $0xf0] sm:$0xff]  ;;  %v205_v45 = vld [vmem:[%s587_s20 + $0xf8] sm:$0xff] }
  0x1a   : > { %v366_v61 = vmax.f32 %v310_v50, 0.0  ;;  %v314_v62 = vadd.f32 %v592_v1, %v251_v51  ;;  %v367_v4 = vmax.f32 %v311_v52, 0.0  ;;  %v368_v5 = vmax.f32 %v312_v53, 0.0 }
  0x1b   : > { %v369_v6 = vmax.f32 %v313_v54, 0.0  ;;  %v315_v7 = vadd.f32 %v592_v1, %v252_v55  ;;  %420 = vst [vmem:[%s615_s25 + $0x40] sm:$0xff] %v364_v59  ;;  %421 = vst [vmem:[%s615_s25 + $0x48] sm:$0xff] %v365_v60  ;;  %v253_v10 = vmul.f32 %v582_v0, %v190_v56  ;;  %v254_v11 = vmul.f32 %v582_v0, %v191_v57  ;;  %v207_v59 = vld [vmem:[%s587_s20 + $0x108] sm:$0xff]  ;;  %v208_v60 = vld [vmem:[%s587_s20 + $0x110] sm:$0xff] }
  0x1c   : > { %422 = vst [vmem:[%s615_s25 + $0x50] sm:$0xff] %v366_v61  ;;  %v370_v9 = vmax.f32 %v314_v62, 0.0  ;;  %v255_v12 = vmul.f32 %v582_v0, %v192_v58  ;;  %423 = vst [vmem:[%s615_s25 + $0x58] sm:$0xff] %v367_v4  ;;  %v256_v15 = vmul.f32 %v582_v0, %v193_v63  ;;  %v257_v16 = vmul.f32 %v582_v0, %v194_v2  ;;  %v206_v58 = vld [vmem:[%s587_s20 + $0x100] sm:$0xff] }
  0x1d   : > { %424 = vst [vmem:[%s615_s25 + $0x60] sm:$0xff] %v368_v5  ;;  %425 = vst [vmem:[%s615_s25 + $0x68] sm:$0xff] %v369_v6  ;;  %v371_v14 = vmax.f32 %v315_v7, 0.0  ;;  %v258_v17 = vmul.f32 %v582_v0, %v195_v3  ;;  %v316_v18 = vadd.f32 %v592_v1, %v253_v10  ;;  %v317_v19 = vadd.f32 %v592_v1, %v254_v11  ;;  %v209_v3 = vld [vmem:[%s587_s20 + $0x118] sm:$0xff]  ;;  %v210_v4 = vld [vmem:[%s587_s20 + $0x120] sm:$0xff] }
  0x1e   : > { %426 = vst [vmem:[%s615_s25 + $0x70] sm:$0xff] %v370_v9  ;;  %v318_v20 = vadd.f32 %v592_v1, %v255_v12  ;;  %v259_v21 = vmul.f32 %v582_v0, %v196_v8  ;;  %v319_v22 = vadd.f32 %v592_v1, %v256_v15  ;;  %v320_v23 = vadd.f32 %v592_v1, %v257_v16  ;;  %v211_v5 = vld [vmem:[%s587_s20 + $0x128] sm:$0xff]  ;;  %v212_v10 = vld [vmem:[%s587_s20 + $0x130] sm:$0xff]  ;;  %v213_v15 = vld [vmem:[%s587_s20 + $0x138] sm:$0xff] }
  0x1f   : > { %427 = vst [vmem:[%s615_s25 + $0x78] sm:$0xff] %v371_v14  ;;  %v321_v24 = vadd.f32 %v592_v1, %v258_v17  ;;  %v260_v25 = vmul.f32 %v582_v0, %v197_v13  ;;  %v372_v29 = vmax.f32 %v316_v18, 0.0  ;;  %v373_v30 = vmax.f32 %v317_v19, 0.0 }
  0x20   : > { %v374_v31 = vmax.f32 %v318_v20, 0.0  ;;  %v322_v32 = vadd.f32 %v592_v1, %v259_v21  ;;  %v375_v36 = vmax.f32 %v319_v22, 0.0  ;;  %v376_v37 = vmax.f32 %v320_v23, 0.0 }
  0x21   : > { %v377_v38 = vmax.f32 %v321_v24, 0.0  ;;  %v323_v39 = vadd.f32 %v592_v1, %v260_v25  ;;  %428 = vst [vmem:[%s615_s25 + $0x80] sm:$0xff] %v372_v29  ;;  %429 = vst [vmem:[%s615_s25 + $0x88] sm:$0xff] %v373_v30  ;;  %v261_v42 = vmul.f32 %v582_v0, %v198_v26  ;;  %v262_v43 = vmul.f32 %v582_v0, %v199_v27  ;;  %v215_v29 = vld [vmem:[%s587_s20 + $0x148] sm:$0xff]  ;;  %v216_v30 = vld [vmem:[%s587_s20 + $0x150] sm:$0xff] }
  0x22   : > { %430 = vst [vmem:[%s615_s25 + $0x90] sm:$0xff] %v374_v31  ;;  %v378_v41 = vmax.f32 %v322_v32, 0.0  ;;  %v263_v44 = vmul.f32 %v582_v0, %v200_v28  ;;  %431 = vst [vmem:[%s615_s25 + $0x98] sm:$0xff] %v375_v36  ;;  %v264_v47 = vmul.f32 %v582_v0, %v201_v33  ;;  %v265_v48 = vmul.f32 %v582_v0, %v202_v34  ;;  %v214_v28 = vld [vmem:[%s587_s20 + $0x140] sm:$0xff] }
  0x23   : > { %432 = vst [vmem:[%s615_s25 + $0xa0] sm:$0xff] %v376_v37  ;;  %433 = vst [vmem:[%s615_s25 + $0xa8] sm:$0xff] %v377_v38  ;;  %v379_v46 = vmax.f32 %v323_v39, 0.0  ;;  %v266_v49 = vmul.f32 %v582_v0, %v203_v35  ;;  %v324_v50 = vadd.f32 %v592_v1, %v261_v42  ;;  %v325_v51 = vadd.f32 %v592_v1, %v262_v43  ;;  %v217_v35 = vld [vmem:[%s587_s20 + $0x158] sm:$0xff]  ;;  %v218_v36 = vld [vmem:[%s587_s20 + $0x160] sm:$0xff] }
  0x24   : > { %434 = vst [vmem:[%s615_s25 + $0xb0] sm:$0xff] %v378_v41  ;;  %v326_v52 = vadd.f32 %v592_v1, %v263_v44  ;;  %v267_v53 = vmul.f32 %v582_v0, %v204_v40  ;;  %v327_v54 = vadd.f32 %v592_v1, %v264_v47  ;;  %v328_v55 = vadd.f32 %v592_v1, %v265_v48  ;;  %v219_v37 = vld [vmem:[%s587_s20 + $0x168] sm:$0xff]  ;;  %v220_v42 = vld [vmem:[%s587_s20 + $0x170] sm:$0xff]  ;;  %v221_v47 = vld [vmem:[%s587_s20 + $0x178] sm:$0xff] }
  0x25   : > { %435 = vst [vmem:[%s615_s25 + $0xb8] sm:$0xff] %v379_v46  ;;  %v329_v56 = vadd.f32 %v592_v1, %v266_v49  ;;  %v268_v57 = vmul.f32 %v582_v0, %v205_v45  ;;  %v380_v61 = vmax.f32 %v324_v50, 0.0  ;;  %v381_v62 = vmax.f32 %v325_v51, 0.0 }
  0x26   : > { %v382_v63 = vmax.f32 %v326_v52, 0.0  ;;  %v330_v2 = vadd.f32 %v592_v1, %v267_v53  ;;  %v383_v6 = vmax.f32 %v327_v54, 0.0  ;;  %v384_v7 = vmax.f32 %v328_v55, 0.0 }
  0x27   : > { %v385_v8 = vmax.f32 %v329_v56, 0.0  ;;  %v331_v9 = vadd.f32 %v592_v1, %v268_v57  ;;  %436 = vst [vmem:[%s615_s25 + $0xc0] sm:$0xff] %v380_v61  ;;  %437 = vst [vmem:[%s615_s25 + $0xc8] sm:$0xff] %v381_v62  ;;  %v269_v12 = vmul.f32 %v582_v0, %v206_v58  ;;  %v270_v13 = vmul.f32 %v582_v0, %v207_v59  ;;  %v223_v61 = vld [vmem:[%s587_s20 + $0x188] sm:$0xff]  ;;  %v224_v62 = vld [vmem:[%s587_s20 + $0x190] sm:$0xff] }
  0x28   : > { %438 = vst [vmem:[%s615_s25 + $0xd0] sm:$0xff] %v382_v63  ;;  %v386_v11 = vmax.f32 %v330_v2, 0.0  ;;  %v271_v14 = vmul.f32 %v582_v0, %v208_v60  ;;  %439 = vst [vmem:[%s615_s25 + $0xd8] sm:$0xff] %v383_v6  ;;  %v272_v17 = vmul.f32 %v582_v0, %v209_v3  ;;  %v273_v18 = vmul.f32 %v582_v0, %v210_v4  ;;  %v222_v60 = vld [vmem:[%s587_s20 + $0x180] sm:$0xff] }
  0x29   : > { %440 = vst [vmem:[%s615_s25 + $0xe0] sm:$0xff] %v384_v7  ;;  %441 = vst [vmem:[%s615_s25 + $0xe8] sm:$0xff] %v385_v8  ;;  %v387_v16 = vmax.f32 %v331_v9, 0.0  ;;  %v274_v19 = vmul.f32 %v582_v0, %v211_v5  ;;  %v332_v20 = vadd.f32 %v592_v1, %v269_v12  ;;  %v333_v21 = vadd.f32 %v592_v1, %v270_v13  ;;  %v225_v5 = vld [vmem:[%s587_s20 + $0x198] sm:$0xff]  ;;  %v226_v6 = vld [vmem:[%s587_s20 + $0x1a0] sm:$0xff] }
  0x2a   : > { %442 = vst [vmem:[%s615_s25 + $0xf0] sm:$0xff] %v386_v11  ;;  %v334_v22 = vadd.f32 %v592_v1, %v271_v14  ;;  %v275_v23 = vmul.f32 %v582_v0, %v212_v10  ;;  %v335_v24 = vadd.f32 %v592_v1, %v272_v17  ;;  %v336_v25 = vadd.f32 %v592_v1, %v273_v18  ;;  %v227_v7 = vld [vmem:[%s587_s20 + $0x1a8] sm:$0xff]  ;;  %v228_v12 = vld [vmem:[%s587_s20 + $0x1b0] sm:$0xff]  ;;  %v229_v17 = vld [vmem:[%s587_s20 + $0x1b8] sm:$0xff] }
  0x2b   : > { %443 = vst [vmem:[%s615_s25 + $0xf8] sm:$0xff] %v387_v16  ;;  %v337_v26 = vadd.f32 %v592_v1, %v274_v19  ;;  %v276_v27 = vmul.f32 %v582_v0, %v213_v15  ;;  %v388_v31 = vmax.f32 %v332_v20, 0.0  ;;  %v389_v32 = vmax.f32 %v333_v21, 0.0 }
  0x2c   : > { %v390_v33 = vmax.f32 %v334_v22, 0.0  ;;  %v338_v34 = vadd.f32 %v592_v1, %v275_v23  ;;  %v391_v38 = vmax.f32 %v335_v24, 0.0  ;;  %v392_v39 = vmax.f32 %v336_v25, 0.0 }
  0x2d   : > { %v393_v40 = vmax.f32 %v337_v26, 0.0  ;;  %v339_v41 = vadd.f32 %v592_v1, %v276_v27  ;;  %444 = vst [vmem:[%s615_s25 + $0x100] sm:$0xff] %v388_v31  ;;  %445 = vst [vmem:[%s615_s25 + $0x108] sm:$0xff] %v389_v32  ;;  %v277_v44 = vmul.f32 %v582_v0, %v214_v28  ;;  %v278_v45 = vmul.f32 %v582_v0, %v215_v29 }
  0x2e   : > { %446 = vst [vmem:[%s615_s25 + $0x110] sm:$0xff] %v390_v33  ;;  %v394_v43 = vmax.f32 %v338_v34, 0.0  ;;  %v279_v46 = vmul.f32 %v582_v0, %v216_v30  ;;  %447 = vst [vmem:[%s615_s25 + $0x118] sm:$0xff] %v391_v38  ;;  %v280_v49 = vmul.f32 %v582_v0, %v217_v35  ;;  %v281_v50 = vmul.f32 %v582_v0, %v218_v36 }
  0x2f   : > { %448 = vst [vmem:[%s615_s25 + $0x120] sm:$0xff] %v392_v39  ;;  %449 = vst [vmem:[%s615_s25 + $0x128] sm:$0xff] %v393_v40  ;;  %v395_v48 = vmax.f32 %v339_v41, 0.0  ;;  %v282_v51 = vmul.f32 %v582_v0, %v219_v37  ;;  %v340_v52 = vadd.f32 %v592_v1, %v277_v44  ;;  %v341_v53 = vadd.f32 %v592_v1, %v278_v45 }
  0x30   : > { %450 = vst [vmem:[%s615_s25 + $0x130] sm:$0xff] %v394_v43  ;;  %v342_v54 = vadd.f32 %v592_v1, %v279_v46  ;;  %v283_v55 = vmul.f32 %v582_v0, %v220_v42  ;;  %v343_v56 = vadd.f32 %v592_v1, %v280_v49  ;;  %v344_v57 = vadd.f32 %v592_v1, %v281_v50 }
  0x31   : > { %451 = vst [vmem:[%s615_s25 + $0x138] sm:$0xff] %v395_v48  ;;  %v345_v58 = vadd.f32 %v592_v1, %v282_v51  ;;  %v284_v59 = vmul.f32 %v582_v0, %v221_v47  ;;  %v396_v63 = vmax.f32 %v340_v52, 0.0  ;;  %v397_v2 = vmax.f32 %v341_v53, 0.0 }
  0x32   : > { %v398_v3 = vmax.f32 %v342_v54, 0.0  ;;  %v346_v4 = vadd.f32 %v592_v1, %v283_v55  ;;  %v399_v8 = vmax.f32 %v343_v56, 0.0  ;;  %v400_v9 = vmax.f32 %v344_v57, 0.0 }
  0x33   : > { %v401_v10 = vmax.f32 %v345_v58, 0.0  ;;  %v347_v11 = vadd.f32 %v592_v1, %v284_v59  ;;  %452 = vst [vmem:[%s615_s25 + $0x140] sm:$0xff] %v396_v63  ;;  %453 = vst [vmem:[%s615_s25 + $0x148] sm:$0xff] %v397_v2  ;;  %v285_v14 = vmul.f32 %v582_v0, %v222_v60  ;;  %v286_v15 = vmul.f32 %v582_v0, %v223_v61 }
  0x34   : > { %454 = vst [vmem:[%s615_s25 + $0x150] sm:$0xff] %v398_v3  ;;  %v402_v13 = vmax.f32 %v346_v4, 0.0  ;;  %v287_v16 = vmul.f32 %v582_v0, %v224_v62  ;;  %455 = vst [vmem:[%s615_s25 + $0x158] sm:$0xff] %v399_v8  ;;  %v288_v19 = vmul.f32 %v582_v0, %v225_v5  ;;  %v289_v20 = vmul.f32 %v582_v0, %v226_v6 }
  0x35   : > { %456 = vst [vmem:[%s615_s25 + $0x160] sm:$0xff] %v400_v9  ;;  %457 = vst [vmem:[%s615_s25 + $0x168] sm:$0xff] %v401_v10  ;;  %v403_v18 = vmax.f32 %v347_v11, 0.0  ;;  %v290_v21 = vmul.f32 %v582_v0, %v227_v7  ;;  %v348_v22 = vadd.f32 %v592_v1, %v285_v14  ;;  %v349_v23 = vadd.f32 %v592_v1, %v286_v15 }
  0x36   : > { %458 = vst [vmem:[%s615_s25 + $0x170] sm:$0xff] %v402_v13  ;;  %v350_v24 = vadd.f32 %v592_v1, %v287_v16  ;;  %v291_v25 = vmul.f32 %v582_v0, %v228_v12  ;;  %v351_v26 = vadd.f32 %v592_v1, %v288_v19  ;;  %v352_v27 = vadd.f32 %v592_v1, %v289_v20 }
  0x37   : > { %459 = vst [vmem:[%s615_s25 + $0x178] sm:$0xff] %v403_v18  ;;  %v353_v28 = vadd.f32 %v592_v1, %v290_v21  ;;  %v292_v29 = vmul.f32 %v582_v0, %v229_v17  ;;  %v404_v30 = vmax.f32 %v348_v22, 0.0  ;;  %v405_v31 = vmax.f32 %v349_v23, 0.0 }
  0x38   : > { %v406_v32 = vmax.f32 %v350_v24, 0.0  ;;  %v354_v33 = vadd.f32 %v592_v1, %v291_v25  ;;  %v407_v34 = vmax.f32 %v351_v26, 0.0  ;;  %v408_v35 = vmax.f32 %v352_v27, 0.0 }
  0x39   : > { %v409_v36 = vmax.f32 %v353_v28, 0.0  ;;  %v355_v37 = vadd.f32 %v592_v1, %v292_v29  ;;  %460 = vst [vmem:[%s615_s25 + $0x180] sm:$0xff] %v404_v30  ;;  %461 = vst [vmem:[%s615_s25 + $0x188] sm:$0xff] %v405_v31 }
  0x3a   : > { %462 = vst [vmem:[%s615_s25 + $0x190] sm:$0xff] %v406_v32  ;;  %v410_v38 = vmax.f32 %v354_v33, 0.0  ;;  %463 = vst [vmem:[%s615_s25 + $0x198] sm:$0xff] %v407_v34 }
  0x3b   : > { %464 = vst [vmem:[%s615_s25 + $0x1a0] sm:$0xff] %v408_v35  ;;  %465 = vst [vmem:[%s615_s25 + $0x1a8] sm:$0xff] %v409_v36  ;;  %v411_v0 = vmax.f32 %v355_v37, 0.0 }
  0x3c   : > { %466 = vst [vmem:[%s615_s25 + $0x1b0] sm:$0xff] %v410_v38 }
  0x3d   : > { %467 = vst [vmem:[%s615_s25 + $0x1b8] sm:$0xff] %v411_v0 }
  0x3e PF: > { %s13_s12 = sadd.s32 1, %s549_s12  }
  0x3f   : > { %p10_p4 = scmp.ge.s32.totalorder %s13_s12, 30  }
  0x41   :  { %12 = sbr.rel (!%p10_p4) target bundleno = 1 (0x1), region = 62 }

</bundles_post_ra>
